<compile_context>
chip_gen: v7x
topology: tpu7x:2x2x1
jax: 0.10.0
libtpu: 0.0.40
codegen_flags: <defaults>
</compile_context>

<pallas_src>
import functools

import jax
import jax.numpy as jnp
from jax.experimental import pallas as pl
from jax.experimental.pallas import tpu as pltpu


# --------------------------------------------------------------------------
# Shared bidirectional-LSTM recurrence (runs inside a kernel body)
# --------------------------------------------------------------------------
def _bilstm_recurrence(T, B, H, x_ref, wih_ref, whh_ref, b_ref, h0_ref, c0_ref,
                       gx_ref, hseq_ref=None):
    """Runs a fused fwd+bwd LSTM layer; returns (h_f_last, h_b_last).

    x_ref   : [T*B, Din]   time-major flattened inputs
    wih_ref : [Din, 8H]    W_ih^T, fwd gates | bwd gates
    whh_ref : [2, H, 4H]   W_hh^T per direction
    b_ref   : [1, 8H]      (b_ih + b_hh), fwd | bwd
    h0_ref  : [2, B, H]    initial hidden (fwd, bwd)
    c0_ref  : [2, B, H]    initial cell   (fwd, bwd)
    gx_ref  : [T*B, 8H]    VMEM scratch for the hoisted input projection
    hseq_ref: [T*B, 2H]    optional per-timestep output (fwd | bwd)
    """
    f32 = jnp.float32
    H4 = 4 * H

    # Hoisted input projection + bias for BOTH directions: one MXU matmul,
    # off the serial critical path.
    gx_ref[...] = (
        jnp.dot(x_ref[...], wih_ref[...], preferred_element_type=f32)
        + b_ref[...]
    )

    whh_f = whh_ref[0]                       # [H, 4H]
    whh_b = whh_ref[1]                       # [H, 4H]
    h_f = h0_ref[0]                          # [B, H]
    h_b = h0_ref[1]                          # [B, H]
    c2 = jnp.concatenate([c0_ref[0], c0_ref[1]], axis=0)   # [2B, H] fwd;bwd

    # Fully unrolled time loop (T is small & static): static slices everywhere
    # and full cross-timestep visibility for the scheduler.
    for t in range(T):
        rt = T - 1 - t                       # reversed index for the bwd dir
        g_f = (jnp.dot(h_f, whh_f, preferred_element_type=f32)
               + gx_ref[t * B:(t + 1) * B, 0:H4])
        g_b = (jnp.dot(h_b, whh_b, preferred_element_type=f32)
               + gx_ref[rt * B:(rt + 1) * B, H4:2 * H4])
        g = jnp.concatenate([g_f, g_b], axis=0)             # [2B, 4H]

        i = jax.nn.sigmoid(g[:, 0:H])
        f = jax.nn.sigmoid(g[:, H:2 * H])
        gg = jnp.tanh(g[:, 2 * H:3 * H])
        o = jax.nn.sigmoid(g[:, 3 * H:4 * H])

        c2 = f * c2 + i * gg                                 # [2B, H]
        h2 = o * jnp.tanh(c2)                                # [2B, H]
        h_f = h2[:B]
        h_b = h2[B:]

        if hseq_ref is not None:
            hseq_ref[t * B:(t + 1) * B, 0:H] = h_f           # fwd @ time t
            hseq_ref[rt * B:(rt + 1) * B, H:2 * H] = h_b     # bwd @ time rt

    return h_f, h_b


def _mid_kernel(T, B, H, x_ref, wih_ref, whh_ref, b_ref, h0_ref, c0_ref,
                hseq_ref, gx_ref):
    _bilstm_recurrence(T, B, H, x_ref, wih_ref, whh_ref, b_ref, h0_ref, c0_ref,
                       gx_ref, hseq_ref=hseq_ref)


def _last_kernel(T, B, H, x_ref, wih_ref, whh_ref, b_ref, h0_ref, c0_ref,
                 wfc_ref, bfc_ref, out_ref, gx_ref):
    # Last layer: only the final hidden states are needed (lstm_out is unused
    # by the module), so no hseq writes; the FC is fused into the epilogue.
    h_f, h_b = _bilstm_recurrence(T, B, H, x_ref, wih_ref, whh_ref, b_ref,
                                  h0_ref, c0_ref, gx_ref, hseq_ref=None)
    # cat([h_f, h_b], -1) @ W_fc^T + b_fc, with W_fc^T split by input half
    # (avoids an in-kernel lane concatenation).
    # TODO(synk): training-mode stochastic dropout not implemented (inference
    # identity), matching nn.Dropout in eval mode.
    out_ref[...] = (
        jnp.dot(h_f, wfc_ref[0], preferred_element_type=jnp.float32)
        + jnp.dot(h_b, wfc_ref[1], preferred_element_type=jnp.float32)
        + bfc_ref[...]
    )


# --------------------------------------------------------------------------
# pallas_call wrappers
# --------------------------------------------------------------------------
def bilstm_mid_layer(x2d, wih, whh, b, h0, c0, *, T, B):
    TB, Din = x2d.shape
    H = whh.shape[1]
    f32 = jnp.float32
    kernel = functools.partial(_mid_kernel, T, B, H)
    return pl.pallas_call(
        kernel,
        grid=(1,),
        in_specs=[
            pl.BlockSpec((TB, Din), lambda i: (0, 0)),
            pl.BlockSpec((Din, 8 * H), lambda i: (0, 0)),
            pl.BlockSpec((2, H, 4 * H), lambda i: (0, 0, 0)),
            pl.BlockSpec((1, 8 * H), lambda i: (0, 0)),
            pl.BlockSpec((2, B, H), lambda i: (0, 0, 0)),
            pl.BlockSpec((2, B, H), lambda i: (0, 0, 0)),
        ],
        out_specs=pl.BlockSpec((TB, 2 * H), lambda i: (0, 0)),
        out_shape=jax.ShapeDtypeStruct((TB, 2 * H), f32),
        scratch_shapes=[pltpu.VMEM((TB, 8 * H), f32)],
    )(x2d, wih, whh, b, h0, c0)


def bilstm_last_layer(x2d, wih, whh, b, h0, c0, wfc, bfc, *, T, B):
    TB, Din = x2d.shape
    H = whh.shape[1]
    O = wfc.shape[2]
    f32 = jnp.float32
    kernel = functools.partial(_last_kernel, T, B, H)
    return pl.pallas_call(
        kernel,
        grid=(1,),
        in_specs=[
            pl.BlockSpec((TB, Din), lambda i: (0, 0)),
            pl.BlockSpec((Din, 8 * H), lambda i: (0, 0)),
            pl.BlockSpec((2, H, 4 * H), lambda i: (0, 0, 0)),
            pl.BlockSpec((1, 8 * H), lambda i: (0, 0)),
            pl.BlockSpec((2, B, H), lambda i: (0, 0, 0)),
            pl.BlockSpec((2, B, H), lambda i: (0, 0, 0)),
            pl.BlockSpec((2, H, O), lambda i: (0, 0, 0)),
            pl.BlockSpec((1, O), lambda i: (0, 0)),
        ],
        out_specs=pl.BlockSpec((B, O), lambda i: (0, 0)),
        out_shape=jax.ShapeDtypeStruct((B, O), f32),
        scratch_shapes=[pltpu.VMEM((TB, 8 * H), f32)],
    )(x2d, wih, whh, b, h0, c0, wfc, bfc)


# --------------------------------------------------------------------------
# Forward pass mirroring bert_lstm.forward(x, hidden)
# --------------------------------------------------------------------------
def bert_lstm_forward(params, x_ids, hidden):
    h0_all, c0_all = hidden                    # each [n_layers*2, B, H]

    # TODO(synk): pretrained BertModel cannot be loaded in-script; replaced by
    # a deterministic embedding lookup producing the [B, T, 768] BERT features.
    feats = params["bert_embedding"][x_ids]    # [B, T, 768]
    B, T, D = feats.shape
    # time-major, row-flattened: [T*B, 768]  (single cheap transpose)
    x = jnp.transpose(feats, (1, 0, 2)).reshape(T * B, D)

    n_layers = len(params["lstm"])
    out = None
    for l, lp in enumerate(params["lstm"]):
        h0 = h0_all[2 * l: 2 * l + 2]          # [2, B, H] (fwd, bwd)
        c0 = c0_all[2 * l: 2 * l + 2]
        if l < n_layers - 1:
            # next layer consumes the [T*B, 2H] fwd|bwd slab directly
            x = bilstm_mid_layer(x, lp["wih"], lp["whh"], lp["b"], h0, c0,
                                 T=T, B=B)
        else:
            out = bilstm_last_layer(x, lp["wih"], lp["whh"], lp["b"], h0, c0,
                                    params["fc"]["w_split"], params["fc"]["b"],
                                    T=T, B=B)
    return out


# --------------------------------------------------------------------------
# Deterministic parameter construction (synthetic, PyTorch-style init),
# stored directly in the fused kernel layouts.
# --------------------------------------------------------------------------
def init_params(key, vocab, d_bert, hidden_dim, n_layers, output_size):
    keys = iter(jax.random.split(key, 3 + n_layers * 2 * 4))
    f32 = jnp.float32
    params = {
        "bert_embedding": 0.02 * jax.random.normal(next(keys), (vocab, d_bert), f32)
    }
    k = 1.0 / float(hidden_dim) ** 0.5
    lstm_layers = []
    for l in range(n_layers):
        din = d_bert if l == 0 else 2 * hidden_dim
        wih_t, whh_t, b_cat = [], [], []
        for _ in range(2):                      # fwd, bwd
            wih = jax.random.uniform(next(keys), (4 * hidden_dim, din), f32, -k, k)
            whh = jax.random.uniform(next(keys), (4 * hidden_dim, hidden_dim), f32, -k, k)
            bih = jax.random.uniform(next(keys), (4 * hidden_dim,), f32, -k, k)
            bhh = jax.random.uniform(next(keys), (4 * hidden_dim,), f32, -k, k)
            wih_t.append(wih.T)                 # [Din, 4H]
            whh_t.append(whh.T)                 # [H, 4H]
            b_cat.append(bih + bhh)             # [4H]
        lstm_layers.append({
            "wih": jnp.concatenate(wih_t, axis=1),       # [Din, 8H]  fwd | bwd
            "whh": jnp.stack(whh_t, axis=0),             # [2, H, 4H]
            "b": jnp.concatenate(b_cat)[None, :],        # [1, 8H]
        })
    params["lstm"] = lstm_layers

    kfc = 1.0 / float(2 * hidden_dim) ** 0.5
    w_fc = jax.random.uniform(next(keys), (output_size, 2 * hidden_dim), f32, -kfc, kfc)
    b_fc = jax.random.uniform(next(keys), (output_size,), f32, -kfc, kfc)
    wt = w_fc.T                                           # [2H, O]
    params["fc"] = {
        "w_split": jnp.stack([wt[:hidden_dim], wt[hidden_dim:]], axis=0),  # [2, H, O]
        "b": b_fc[None, :],                                                # [1, O]
    }
    return params


if __name__ == "__main__":
    B, T = 2, 8
    HIDDEN_DIM, N_LAYERS, OUTPUT_SIZE = 32, 2, 4
    D_BERT, VOCAB = 768, 100

    key = jax.random.PRNGKey(0)
    pkey, xkey = jax.random.split(key)
    params = init_params(pkey, VOCAB, D_BERT, HIDDEN_DIM, N_LAYERS, OUTPUT_SIZE)

    x_ids = jax.random.randint(xkey, (B, T), 0, VOCAB, dtype=jnp.int32)
    # init_hidden(batch_size): zero (h0, c0) of shape [n_layers*2, B, H]
    hidden = (jnp.zeros((N_LAYERS * 2, B, HIDDEN_DIM), jnp.float32),
              jnp.zeros((N_LAYERS * 2, B, HIDDEN_DIM), jnp.float32))

    out = bert_lstm_forward(params, x_ids, hidden)
    out = jax.block_until_ready(out)
    assert out.shape == (B, OUTPUT_SIZE), out.shape
    print("KERNEL_OK")
</pallas_src>

<mosaic_0001>
module attributes {stable_mosaic.version = 11 : i64} {
  func.func @_mid_kernel(%arg0: i32, %arg1: memref<16x768xf32, #tpu.memory_space<vmem>>, %arg2: memref<768x256xf32, #tpu.memory_space<vmem>>, %arg3: memref<2x32x128xf32, #tpu.memory_space<vmem>>, %arg4: memref<1x256xf32, #tpu.memory_space<vmem>>, %arg5: memref<2x2x32xf32, #tpu.memory_space<vmem>>, %arg6: memref<2x2x32xf32, #tpu.memory_space<vmem>>, %arg7: memref<16x64xf32, #tpu.memory_space<vmem>>, %arg8: memref<16x256xf32, #tpu.memory_space<vmem>>) attributes {dimension_semantics = [#tpu.dimension_semantics<arbitrary>], iteration_bounds = array<i64: 1>, scalar_prefetch = 0 : i64, scratch_operands = 1 : i64, tpu.core_type = #tpu.core_type<tc>, window_params = [{pipeline_mode = #tpu.pipeline_mode<synchronous>, transform_indices = @transform_0, window_bounds = array<i64: 16, 768>}, {pipeline_mode = #tpu.pipeline_mode<synchronous>, transform_indices = @transform_1, window_bounds = array<i64: 768, 256>}, {pipeline_mode = #tpu.pipeline_mode<synchronous>, transform_indices = @transform_2, window_bounds = array<i64: 2, 32, 128>}, {pipeline_mode = #tpu.pipeline_mode<synchronous>, transform_indices = @transform_3, window_bounds = array<i64: 1, 256>}, {pipeline_mode = #tpu.pipeline_mode<synchronous>, transform_indices = @transform_4, window_bounds = array<i64: 2, 2, 32>}, {pipeline_mode = #tpu.pipeline_mode<synchronous>, transform_indices = @transform_5, window_bounds = array<i64: 2, 2, 32>}, {pipeline_mode = #tpu.pipeline_mode<synchronous>, transform_indices = @transform_6, window_bounds = array<i64: 16, 64>}]} {
    %c0 = arith.constant 0 : index
    %c0_0 = arith.constant 0 : index
    %0 = vector.load %arg1[%c0, %c0_0] : memref<16x768xf32, #tpu.memory_space<vmem>>, vector<16x768xf32>
    %c0_1 = arith.constant 0 : index
    %c0_2 = arith.constant 0 : index
    %1 = vector.load %arg2[%c0_1, %c0_2] : memref<768x256xf32, #tpu.memory_space<vmem>>, vector<768x256xf32>
    %cst = arith.constant dense<0.000000e+00> : vector<16x256xf32>
    %2 = tpu.matmul %0, %1, %cst {dimension_numbers = #tpu.dot_dimension_numbers<[1], [0], [0], [1], [0, 0, 1, 1], [], []>} : vector<16x768xf32>, vector<768x256xf32>, vector<16x256xf32> -> vector<16x256xf32>
    %c0_3 = arith.constant 0 : index
    %c0_4 = arith.constant 0 : index
    %3 = vector.load %arg4[%c0_3, %c0_4] : memref<1x256xf32, #tpu.memory_space<vmem>>, vector<1x256xf32>
    %4 = vector.broadcast %3 : vector<1x256xf32> to vector<16x256xf32>
    %5 = arith.addf %2, %4 : vector<16x256xf32>
    %c0_5 = arith.constant 0 : index
    %c0_6 = arith.constant 0 : index
    %6 = vector.load %arg8[%c0_5, %c0_6] : memref<16x256xf32, #tpu.memory_space<vmem>>, vector<16x256xf32>
    tpu.vector_store %arg8[%c0_5, %c0_6], %5 {strides = array<i32>} : memref<16x256xf32, #tpu.memory_space<vmem>>, vector<16x256xf32>,
    %c0_7 = arith.constant 0 : index
    %c0_8 = arith.constant 0 : index
    %c0_9 = arith.constant 0 : index
    %7 = vector.load %arg3[%c0_7, %c0_8, %c0_9] : memref<2x32x128xf32, #tpu.memory_space<vmem>>, vector<1x32x128xf32>
    %8 = vector.shape_cast %7 : vector<1x32x128xf32> to vector<32x128xf32>
    %c1 = arith.constant 1 : index
    %c0_10 = arith.constant 0 : index
    %c0_11 = arith.constant 0 : index
    %9 = vector.load %arg3[%c1, %c0_10, %c0_11] : memref<2x32x128xf32, #tpu.memory_space<vmem>>, vector<1x32x128xf32>
    %10 = vector.shape_cast %9 : vector<1x32x128xf32> to vector<32x128xf32>
    %c0_12 = arith.constant 0 : index
    %c0_13 = arith.constant 0 : index
    %c0_14 = arith.constant 0 : index
    %11 = vector.load %arg5[%c0_12, %c0_13, %c0_14] : memref<2x2x32xf32, #tpu.memory_space<vmem>>, vector<1x2x32xf32>
    %12 = vector.shape_cast %11 : vector<1x2x32xf32> to vector<2x32xf32>
    %c1_15 = arith.constant 1 : index
    %c0_16 = arith.constant 0 : index
    %c0_17 = arith.constant 0 : index
    %13 = vector.load %arg5[%c1_15, %c0_16, %c0_17] : memref<2x2x32xf32, #tpu.memory_space<vmem>>, vector<1x2x32xf32>
    %14 = vector.shape_cast %13 : vector<1x2x32xf32> to vector<2x32xf32>
    %c0_18 = arith.constant 0 : index
    %c0_19 = arith.constant 0 : index
    %c0_20 = arith.constant 0 : index
    %15 = vector.load %arg6[%c0_18, %c0_19, %c0_20] : memref<2x2x32xf32, #tpu.memory_space<vmem>>, vector<1x2x32xf32>
    %16 = vector.shape_cast %15 : vector<1x2x32xf32> to vector<2x32xf32>
    %c1_21 = arith.constant 1 : index
    %c0_22 = arith.constant 0 : index
    %c0_23 = arith.constant 0 : index
    %17 = vector.load %arg6[%c1_21, %c0_22, %c0_23] : memref<2x2x32xf32, #tpu.memory_space<vmem>>, vector<1x2x32xf32>
    %18 = vector.shape_cast %17 : vector<1x2x32xf32> to vector<2x32xf32>
    %19 = tpu.concatenate %16, %18 in 0 : vector<2x32xf32>, vector<2x32xf32> -> vector<4x32xf32>
    %cst_24 = arith.constant dense<0.000000e+00> : vector<2x128xf32>
    %20 = tpu.matmul %12, %8, %cst_24 {dimension_numbers = #tpu.dot_dimension_numbers<[1], [0], [0], [1], [0, 0, 1, 1], [], []>} : vector<2x32xf32>, vector<32x128xf32>, vector<2x128xf32> -> vector<2x128xf32>
    %c0_25 = arith.constant 0 : index
    %c0_26 = arith.constant 0 : index
    %21 = vector.load %arg8[%c0_25, %c0_26] : memref<16x256xf32, #tpu.memory_space<vmem>>, vector<2x128xf32>
    %22 = arith.addf %20, %21 : vector<2x128xf32>
    %cst_27 = arith.constant dense<0.000000e+00> : vector<2x128xf32>
    %23 = tpu.matmul %14, %10, %cst_27 {dimension_numbers = #tpu.dot_dimension_numbers<[1], [0], [0], [1], [0, 0, 1, 1], [], []>} : vector<2x32xf32>, vector<32x128xf32>, vector<2x128xf32> -> vector<2x128xf32>
    %c14 = arith.constant 14 : index
    %c128 = arith.constant 128 : index
    %24 = vector.load %arg8[%c14, %c128] : memref<16x256xf32, #tpu.memory_space<vmem>>, vector<2x128xf32>
    %25 = arith.addf %23, %24 : vector<2x128xf32>
    %26 = tpu.concatenate %22, %25 in 0 : vector<2x128xf32>, vector<2x128xf32> -> vector<4x128xf32>
    %27 = vector.extract_strided_slice %26 {offsets = [0, 0], sizes = [4, 32], strides = [1, 1]} : vector<4x128xf32> to vector<4x32xf32>
    %28 = arith.negf %27 : vector<4x32xf32>
    %29 = math.exp %28 : vector<4x32xf32>
    %cst_28 = arith.constant 1.000000e+00 : f32
    %30 = vector.broadcast %cst_28 : f32 to vector<4x32xf32>
    %31 = arith.addf %30, %29 : vector<4x32xf32>
    %32 = arith.divf %30, %31 : vector<4x32xf32>
    %33 = vector.extract_strided_slice %26 {offsets = [0, 32], sizes = [4, 32], strides = [1, 1]} : vector<4x128xf32> to vector<4x32xf32>
    %34 = arith.negf %33 : vector<4x32xf32>
    %35 = math.exp %34 : vector<4x32xf32>
    %cst_29 = arith.constant 1.000000e+00 : f32
    %36 = vector.broadcast %cst_29 : f32 to vector<4x32xf32>
    %37 = arith.addf %36, %35 : vector<4x32xf32>
    %38 = arith.divf %36, %37 : vector<4x32xf32>
    %39 = vector.extract_strided_slice %26 {offsets = [0, 64], sizes = [4, 32], strides = [1, 1]} : vector<4x128xf32> to vector<4x32xf32>
    %40 = math.tanh %39 : vector<4x32xf32>
    %41 = vector.extract_strided_slice %26 {offsets = [0, 96], sizes = [4, 32], strides = [1, 1]} : vector<4x128xf32> to vector<4x32xf32>
    %42 = arith.negf %41 : vector<4x32xf32>
    %43 = math.exp %42 : vector<4x32xf32>
    %cst_30 = arith.constant 1.000000e+00 : f32
    %44 = vector.broadcast %cst_30 : f32 to vector<4x32xf32>
    %45 = arith.addf %44, %43 : vector<4x32xf32>
    %46 = arith.divf %44, %45 : vector<4x32xf32>
    %47 = arith.mulf %38, %19 : vector<4x32xf32>
    %48 = arith.mulf %32, %40 : vector<4x32xf32>
    %49 = arith.addf %47, %48 : vector<4x32xf32>
    %50 = math.tanh %49 : vector<4x32xf32>
    %51 = arith.mulf %46, %50 : vector<4x32xf32>
    %52 = vector.extract_strided_slice %51 {offsets = [0, 0], sizes = [2, 32], strides = [1, 1]} : vector<4x32xf32> to vector<2x32xf32>
    %53 = vector.extract_strided_slice %51 {offsets = [2, 0], sizes = [2, 32], strides = [1, 1]} : vector<4x32xf32> to vector<2x32xf32>
    %c0_31 = arith.constant 0 : index
    %c0_32 = arith.constant 0 : index
    %54 = vector.load %arg7[%c0_31, %c0_32] : memref<16x64xf32, #tpu.memory_space<vmem>>, vector<2x32xf32>
    tpu.vector_store %arg7[%c0_31, %c0_32], %52 {strides = array<i32>} : memref<16x64xf32, #tpu.memory_space<vmem>>, vector<2x32xf32>,
    %c14_33 = arith.constant 14 : index
    %c32 = arith.constant 32 : index
    %55 = vector.load %arg7[%c14_33, %c32] : memref<16x64xf32, #tpu.memory_space<vmem>>, vector<2x32xf32>
    tpu.vector_store %arg7[%c14_33, %c32], %53 {strides = array<i32>} : memref<16x64xf32, #tpu.memory_space<vmem>>, vector<2x32xf32>,
    %cst_34 = arith.constant dense<0.000000e+00> : vector<2x128xf32>
    %56 = tpu.matmul %52, %8, %cst_34 {dimension_numbers = #tpu.dot_dimension_numbers<[1], [0], [0], [1], [0, 0, 1, 1], [], []>} : vector<2x32xf32>, vector<32x128xf32>, vector<2x128xf32> -> vector<2x128xf32>
    %c2 = arith.constant 2 : index
    %c0_35 = arith.constant 0 : index
    %57 = vector.load %arg8[%c2, %c0_35] : memref<16x256xf32, #tpu.memory_space<vmem>>, vector<2x128xf32>
    %58 = arith.addf %56, %57 : vector<2x128xf32>
    %cst_36 = arith.constant dense<0.000000e+00> : vector<2x128xf32>
    %59 = tpu.matmul %53, %10, %cst_36 {dimension_numbers = #tpu.dot_dimension_numbers<[1], [0], [0], [1], [0, 0, 1, 1], [], []>} : vector<2x32xf32>, vector<32x128xf32>, vector<2x128xf32> -> vector<2x128xf32>
    %c12 = arith.constant 12 : index
    %c128_37 = arith.constant 128 : index
    %60 = vector.load %arg8[%c12, %c128_37] : memref<16x256xf32, #tpu.memory_space<vmem>>, vector<2x128xf32>
    %61 = arith.addf %59, %60 : vector<2x128xf32>
    %62 = tpu.concatenate %58, %61 in 0 : vector<2x128xf32>, vector<2x128xf32> -> vector<4x128xf32>
    %63 = vector.extract_strided_slice %62 {offsets = [0, 0], sizes = [4, 32], strides = [1, 1]} : vector<4x128xf32> to vector<4x32xf32>
    %64 = arith.negf %63 : vector<4x32xf32>
    %65 = math.exp %64 : vector<4x32xf32>
    %cst_38 = arith.constant 1.000000e+00 : f32
    %66 = vector.broadcast %cst_38 : f32 to vector<4x32xf32>
    %67 = arith.addf %66, %65 : vector<4x32xf32>
    %68 = arith.divf %66, %67 : vector<4x32xf32>
    %69 = vector.extract_strided_slice %62 {offsets = [0, 32], sizes = [4, 32], strides = [1, 1]} : vector<4x128xf32> to vector<4x32xf32>
    %70 = arith.negf %69 : vector<4x32xf32>
    %71 = math.exp %70 : vector<4x32xf32>
    %cst_39 = arith.constant 1.000000e+00 : f32
    %72 = vector.broadcast %cst_39 : f32 to vector<4x32xf32>
    %73 = arith.addf %72, %71 : vector<4x32xf32>
    %74 = arith.divf %72, %73 : vector<4x32xf32>
    %75 = vector.extract_strided_slice %62 {offsets = [0, 64], sizes = [4, 32], strides = [1, 1]} : vector<4x128xf32> to vector<4x32xf32>
    %76 = math.tanh %75 : vector<4x32xf32>
    %77 = vector.extract_strided_slice %62 {offsets = [0, 96], sizes = [4, 32], strides = [1, 1]} : vector<4x128xf32> to vector<4x32xf32>
    %78 = arith.negf %77 : vector<4x32xf32>
    %79 = math.exp %78 : vector<4x32xf32>
    %cst_40 = arith.constant 1.000000e+00 : f32
    %80 = vector.broadcast %cst_40 : f32 to vector<4x32xf32>
    %81 = arith.addf %80, %79 : vector<4x32xf32>
    %82 = arith.divf %80, %81 : vector<4x32xf32>
    %83 = arith.mulf %74, %49 : vector<4x32xf32>
    %84 = arith.mulf %68, %76 : vector<4x32xf32>
    %85 = arith.addf %83, %84 : vector<4x32xf32>
    %86 = math.tanh %85 : vector<4x32xf32>
    %87 = arith.mulf %82, %86 : vector<4x32xf32>
    %88 = vector.extract_strided_slice %87 {offsets = [0, 0], sizes = [2, 32], strides = [1, 1]} : vector<4x32xf32> to vector<2x32xf32>
    %89 = vector.extract_strided_slice %87 {offsets = [2, 0], sizes = [2, 32], strides = [1, 1]} : vector<4x32xf32> to vector<2x32xf32>
    %c2_41 = arith.constant 2 : index
    %c0_42 = arith.constant 0 : index
    %90 = vector.load %arg7[%c2_41, %c0_42] : memref<16x64xf32, #tpu.memory_space<vmem>>, vector<2x32xf32>
    tpu.vector_store %arg7[%c2_41, %c0_42], %88 {strides = array<i32>} : memref<16x64xf32, #tpu.memory_space<vmem>>, vector<2x32xf32>,
    %c12_43 = arith.constant 12 : index
    %c32_44 = arith.constant 32 : index
    %91 = vector.load %arg7[%c12_43, %c32_44] : memref<16x64xf32, #tpu.memory_space<vmem>>, vector<2x32xf32>
    tpu.vector_store %arg7[%c12_43, %c32_44], %89 {strides = array<i32>} : memref<16x64xf32, #tpu.memory_space<vmem>>, vector<2x32xf32>,
    %cst_45 = arith.constant dense<0.000000e+00> : vector<2x128xf32>
    %92 = tpu.matmul %88, %8, %cst_45 {dimension_numbers = #tpu.dot_dimension_numbers<[1], [0], [0], [1], [0, 0, 1, 1], [], []>} : vector<2x32xf32>, vector<32x128xf32>, vector<2x128xf32> -> vector<2x128xf32>
    %c4 = arith.constant 4 : index
    %c0_46 = arith.constant 0 : index
    %93 = vector.load %arg8[%c4, %c0_46] : memref<16x256xf32, #tpu.memory_space<vmem>>, vector<2x128xf32>
    %94 = arith.addf %92, %93 : vector<2x128xf32>
    %cst_47 = arith.constant dense<0.000000e+00> : vector<2x128xf32>
    %95 = tpu.matmul %89, %10, %cst_47 {dimension_numbers = #tpu.dot_dimension_numbers<[1], [0], [0], [1], [0, 0, 1, 1], [], []>} : vector<2x32xf32>, vector<32x128xf32>, vector<2x128xf32> -> vector<2x128xf32>
    %c10 = arith.constant 10 : index
    %c128_48 = arith.constant 128 : index
    %96 = vector.load %arg8[%c10, %c128_48] : memref<16x256xf32, #tpu.memory_space<vmem>>, vector<2x128xf32>
    %97 = arith.addf %95, %96 : vector<2x128xf32>
    %98 = tpu.concatenate %94, %97 in 0 : vector<2x128xf32>, vector<2x128xf32> -> vector<4x128xf32>
    %99 = vector.extract_strided_slice %98 {offsets = [0, 0], sizes = [4, 32], strides = [1, 1]} : vector<4x128xf32> to vector<4x32xf32>
    %100 = arith.negf %99 : vector<4x32xf32>
    %101 = math.exp %100 : vector<4x32xf32>
    %cst_49 = arith.constant 1.000000e+00 : f32
    %102 = vector.broadcast %cst_49 : f32 to vector<4x32xf32>
    %103 = arith.addf %102, %101 : vector<4x32xf32>
    %104 = arith.divf %102, %103 : vector<4x32xf32>
    %105 = vector.extract_strided_slice %98 {offsets = [0, 32], sizes = [4, 32], strides = [1, 1]} : vector<4x128xf32> to vector<4x32xf32>
    %106 = arith.negf %105 : vector<4x32xf32>
    %107 = math.exp %106 : vector<4x32xf32>
    %cst_50 = arith.constant 1.000000e+00 : f32
    %108 = vector.broadcast %cst_50 : f32 to vector<4x32xf32>
    %109 = arith.addf %108, %107 : vector<4x32xf32>
    %110 = arith.divf %108, %109 : vector<4x32xf32>
    %111 = vector.extract_strided_slice %98 {offsets = [0, 64], sizes = [4, 32], strides = [1, 1]} : vector<4x128xf32> to vector<4x32xf32>
    %112 = math.tanh %111 : vector<4x32xf32>
    %113 = vector.extract_strided_slice %98 {offsets = [0, 96], sizes = [4, 32], strides = [1, 1]} : vector<4x128xf32> to vector<4x32xf32>
    %114 = arith.negf %113 : vector<4x32xf32>
    %115 = math.exp %114 : vector<4x32xf32>
    %cst_51 = arith.constant 1.000000e+00 : f32
    %116 = vector.broadcast %cst_51 : f32 to vector<4x32xf32>
    %117 = arith.addf %116, %115 : vector<4x32xf32>
    %118 = arith.divf %116, %117 : vector<4x32xf32>
    %119 = arith.mulf %110, %85 : vector<4x32xf32>
    %120 = arith.mulf %104, %112 : vector<4x32xf32>
    %121 = arith.addf %119, %120 : vector<4x32xf32>
    %122 = math.tanh %121 : vector<4x32xf32>
    %123 = arith.mulf %118, %122 : vector<4x32xf32>
    %124 = vector.extract_strided_slice %123 {offsets = [0, 0], sizes = [2, 32], strides = [1, 1]} : vector<4x32xf32> to vector<2x32xf32>
    %125 = vector.extract_strided_slice %123 {offsets = [2, 0], sizes = [2, 32], strides = [1, 1]} : vector<4x32xf32> to vector<2x32xf32>
    %c4_52 = arith.constant 4 : index
    %c0_53 = arith.constant 0 : index
    %126 = vector.load %arg7[%c4_52, %c0_53] : memref<16x64xf32, #tpu.memory_space<vmem>>, vector<2x32xf32>
    tpu.vector_store %arg7[%c4_52, %c0_53], %124 {strides = array<i32>} : memref<16x64xf32, #tpu.memory_space<vmem>>, vector<2x32xf32>,
    %c10_54 = arith.constant 10 : index
    %c32_55 = arith.constant 32 : index
    %127 = vector.load %arg7[%c10_54, %c32_55] : memref<16x64xf32, #tpu.memory_space<vmem>>, vector<2x32xf32>
    tpu.vector_store %arg7[%c10_54, %c32_55], %125 {strides = array<i32>} : memref<16x64xf32, #tpu.memory_space<vmem>>, vector<2x32xf32>,
    %cst_56 = arith.constant dense<0.000000e+00> : vector<2x128xf32>
    %128 = tpu.matmul %124, %8, %cst_56 {dimension_numbers = #tpu.dot_dimension_numbers<[1], [0], [0], [1], [0, 0, 1, 1], [], []>} : vector<2x32xf32>, vector<32x128xf32>, vector<2x128xf32> -> vector<2x128xf32>
    %c6 = arith.constant 6 : index
    %c0_57 = arith.constant 0 : index
    %129 = vector.load %arg8[%c6, %c0_57] : memref<16x256xf32, #tpu.memory_space<vmem>>, vector<2x128xf32>
    %130 = arith.addf %128, %129 : vector<2x128xf32>
    %cst_58 = arith.constant dense<0.000000e+00> : vector<2x128xf32>
    %131 = tpu.matmul %125, %10, %cst_58 {dimension_numbers = #tpu.dot_dimension_numbers<[1], [0], [0], [1], [0, 0, 1, 1], [], []>} : vector<2x32xf32>, vector<32x128xf32>, vector<2x128xf32> -> vector<2x128xf32>
    %c8 = arith.constant 8 : index
    %c128_59 = arith.constant 128 : index
    %132 = vector.load %arg8[%c8, %c128_59] : memref<16x256xf32, #tpu.memory_space<vmem>>, vector<2x128xf32>
    %133 = arith.addf %131, %132 : vector<2x128xf32>
    %134 = tpu.concatenate %130, %133 in 0 : vector<2x128xf32>, vector<2x128xf32> -> vector<4x128xf32>
    %135 = vector.extract_strided_slice %134 {offsets = [0, 0], sizes = [4, 32], strides = [1, 1]} : vector<4x128xf32> to vector<4x32xf32>
    %136 = arith.negf %135 : vector<4x32xf32>
    %137 = math.exp %136 : vector<4x32xf32>
    %cst_60 = arith.constant 1.000000e+00 : f32
    %138 = vector.broadcast %cst_60 : f32 to vector<4x32xf32>
    %139 = arith.addf %138, %137 : vector<4x32xf32>
    %140 = arith.divf %138, %139 : vector<4x32xf32>
    %141 = vector.extract_strided_slice %134 {offsets = [0, 32], sizes = [4, 32], strides = [1, 1]} : vector<4x128xf32> to vector<4x32xf32>
    %142 = arith.negf %141 : vector<4x32xf32>
    %143 = math.exp %142 : vector<4x32xf32>
    %cst_61 = arith.constant 1.000000e+00 : f32
    %144 = vector.broadcast %cst_61 : f32 to vector<4x32xf32>
    %145 = arith.addf %144, %143 : vector<4x32xf32>
    %146 = arith.divf %144, %145 : vector<4x32xf32>
    %147 = vector.extract_strided_slice %134 {offsets = [0, 64], sizes = [4, 32], strides = [1, 1]} : vector<4x128xf32> to vector<4x32xf32>
    %148 = math.tanh %147 : vector<4x32xf32>
    %149 = vector.extract_strided_slice %134 {offsets = [0, 96], sizes = [4, 32], strides = [1, 1]} : vector<4x128xf32> to vector<4x32xf32>
    %150 = arith.negf %149 : vector<4x32xf32>
    %151 = math.exp %150 : vector<4x32xf32>
    %cst_62 = arith.constant 1.000000e+00 : f32
    %152 = vector.broadcast %cst_62 : f32 to vector<4x32xf32>
    %153 = arith.addf %152, %151 : vector<4x32xf32>
    %154 = arith.divf %152, %153 : vector<4x32xf32>
    %155 = arith.mulf %146, %121 : vector<4x32xf32>
    %156 = arith.mulf %140, %148 : vector<4x32xf32>
    %157 = arith.addf %155, %156 : vector<4x32xf32>
    %158 = math.tanh %157 : vector<4x32xf32>
    %159 = arith.mulf %154, %158 : vector<4x32xf32>
    %160 = vector.extract_strided_slice %159 {offsets = [0, 0], sizes = [2, 32], strides = [1, 1]} : vector<4x32xf32> to vector<2x32xf32>
    %161 = vector.extract_strided_slice %159 {offsets = [2, 0], sizes = [2, 32], strides = [1, 1]} : vector<4x32xf32> to vector<2x32xf32>
    %c6_63 = arith.constant 6 : index
    %c0_64 = arith.constant 0 : index
    %162 = vector.load %arg7[%c6_63, %c0_64] : memref<16x64xf32, #tpu.memory_space<vmem>>, vector<2x32xf32>
    tpu.vector_store %arg7[%c6_63, %c0_64], %160 {strides = array<i32>} : memref<16x64xf32, #tpu.memory_space<vmem>>, vector<2x32xf32>,
    %c8_65 = arith.constant 8 : index
    %c32_66 = arith.constant 32 : index
    %163 = vector.load %arg7[%c8_65, %c32_66] : memref<16x64xf32, #tpu.memory_space<vmem>>, vector<2x32xf32>
    tpu.vector_store %arg7[%c8_65, %c32_66], %161 {strides = array<i32>} : memref<16x64xf32, #tpu.memory_space<vmem>>, vector<2x32xf32>,
    %cst_67 = arith.constant dense<0.000000e+00> : vector<2x128xf32>
    %164 = tpu.matmul %160, %8, %cst_67 {dimension_numbers = #tpu.dot_dimension_numbers<[1], [0], [0], [1], [0, 0, 1, 1], [], []>} : vector<2x32xf32>, vector<32x128xf32>, vector<2x128xf32> -> vector<2x128xf32>
    %c8_68 = arith.constant 8 : index
    %c0_69 = arith.constant 0 : index
    %165 = vector.load %arg8[%c8_68, %c0_69] : memref<16x256xf32, #tpu.memory_space<vmem>>, vector<2x128xf32>
    %166 = arith.addf %164, %165 : vector<2x128xf32>
    %cst_70 = arith.constant dense<0.000000e+00> : vector<2x128xf32>
    %167 = tpu.matmul %161, %10, %cst_70 {dimension_numbers = #tpu.dot_dimension_numbers<[1], [0], [0], [1], [0, 0, 1, 1], [], []>} : vector<2x32xf32>, vector<32x128xf32>, vector<2x128xf32> -> vector<2x128xf32>
    %c6_71 = arith.constant 6 : index
    %c128_72 = arith.constant 128 : index
    %168 = vector.load %arg8[%c6_71, %c128_72] : memref<16x256xf32, #tpu.memory_space<vmem>>, vector<2x128xf32>
    %169 = arith.addf %167, %168 : vector<2x128xf32>
    %170 = tpu.concatenate %166, %169 in 0 : vector<2x128xf32>, vector<2x128xf32> -> vector<4x128xf32>
    %171 = vector.extract_strided_slice %170 {offsets = [0, 0], sizes = [4, 32], strides = [1, 1]} : vector<4x128xf32> to vector<4x32xf32>
    %172 = arith.negf %171 : vector<4x32xf32>
    %173 = math.exp %172 : vector<4x32xf32>
    %cst_73 = arith.constant 1.000000e+00 : f32
    %174 = vector.broadcast %cst_73 : f32 to vector<4x32xf32>
    %175 = arith.addf %174, %173 : vector<4x32xf32>
    %176 = arith.divf %174, %175 : vector<4x32xf32>
    %177 = vector.extract_strided_slice %170 {offsets = [0, 32], sizes = [4, 32], strides = [1, 1]} : vector<4x128xf32> to vector<4x32xf32>
    %178 = arith.negf %177 : vector<4x32xf32>
    %179 = math.exp %178 : vector<4x32xf32>
    %cst_74 = arith.constant 1.000000e+00 : f32
    %180 = vector.broadcast %cst_74 : f32 to vector<4x32xf32>
    %181 = arith.addf %180, %179 : vector<4x32xf32>
    %182 = arith.divf %180, %181 : vector<4x32xf32>
    %183 = vector.extract_strided_slice %170 {offsets = [0, 64], sizes = [4, 32], strides = [1, 1]} : vector<4x128xf32> to vector<4x32xf32>
    %184 = math.tanh %183 : vector<4x32xf32>
    %185 = vector.extract_strided_slice %170 {offsets = [0, 96], sizes = [4, 32], strides = [1, 1]} : vector<4x128xf32> to vector<4x32xf32>
    %186 = arith.negf %185 : vector<4x32xf32>
    %187 = math.exp %186 : vector<4x32xf32>
    %cst_75 = arith.constant 1.000000e+00 : f32
    %188 = vector.broadcast %cst_75 : f32 to vector<4x32xf32>
    %189 = arith.addf %188, %187 : vector<4x32xf32>
    %190 = arith.divf %188, %189 : vector<4x32xf32>
    %191 = arith.mulf %182, %157 : vector<4x32xf32>
    %192 = arith.mulf %176, %184 : vector<4x32xf32>
    %193 = arith.addf %191, %192 : vector<4x32xf32>
    %194 = math.tanh %193 : vector<4x32xf32>
    %195 = arith.mulf %190, %194 : vector<4x32xf32>
    %196 = vector.extract_strided_slice %195 {offsets = [0, 0], sizes = [2, 32], strides = [1, 1]} : vector<4x32xf32> to vector<2x32xf32>
    %197 = vector.extract_strided_slice %195 {offsets = [2, 0], sizes = [2, 32], strides = [1, 1]} : vector<4x32xf32> to vector<2x32xf32>
    %c8_76 = arith.constant 8 : index
    %c0_77 = arith.constant 0 : index
    %198 = vector.load %arg7[%c8_76, %c0_77] : memref<16x64xf32, #tpu.memory_space<vmem>>, vector<2x32xf32>
    tpu.vector_store %arg7[%c8_76, %c0_77], %196 {strides = array<i32>} : memref<16x64xf32, #tpu.memory_space<vmem>>, vector<2x32xf32>,
    %c6_78 = arith.constant 6 : index
    %c32_79 = arith.constant 32 : index
    %199 = vector.load %arg7[%c6_78, %c32_79] : memref<16x64xf32, #tpu.memory_space<vmem>>, vector<2x32xf32>
    tpu.vector_store %arg7[%c6_78, %c32_79], %197 {strides = array<i32>} : memref<16x64xf32, #tpu.memory_space<vmem>>, vector<2x32xf32>,
    %cst_80 = arith.constant dense<0.000000e+00> : vector<2x128xf32>
    %200 = tpu.matmul %196, %8, %cst_80 {dimension_numbers = #tpu.dot_dimension_numbers<[1], [0], [0], [1], [0, 0, 1, 1], [], []>} : vector<2x32xf32>, vector<32x128xf32>, vector<2x128xf32> -> vector<2x128xf32>
    %c10_81 = arith.constant 10 : index
    %c0_82 = arith.constant 0 : index
    %201 = vector.load %arg8[%c10_81, %c0_82] : memref<16x256xf32, #tpu.memory_space<vmem>>, vector<2x128xf32>
    %202 = arith.addf %200, %201 : vector<2x128xf32>
    %cst_83 = arith.constant dense<0.000000e+00> : vector<2x128xf32>
    %203 = tpu.matmul %197, %10, %cst_83 {dimension_numbers = #tpu.dot_dimension_numbers<[1], [0], [0], [1], [0, 0, 1, 1], [], []>} : vector<2x32xf32>, vector<32x128xf32>, vector<2x128xf32> -> vector<2x128xf32>
    %c4_84 = arith.constant 4 : index
    %c128_85 = arith.constant 128 : index
    %204 = vector.load %arg8[%c4_84, %c128_85] : memref<16x256xf32, #tpu.memory_space<vmem>>, vector<2x128xf32>
    %205 = arith.addf %203, %204 : vector<2x128xf32>
    %206 = tpu.concatenate %202, %205 in 0 : vector<2x128xf32>, vector<2x128xf32> -> vector<4x128xf32>
    %207 = vector.extract_strided_slice %206 {offsets = [0, 0], sizes = [4, 32], strides = [1, 1]} : vector<4x128xf32> to vector<4x32xf32>
    %208 = arith.negf %207 : vector<4x32xf32>
    %209 = math.exp %208 : vector<4x32xf32>
    %cst_86 = arith.constant 1.000000e+00 : f32
    %210 = vector.broadcast %cst_86 : f32 to vector<4x32xf32>
    %211 = arith.addf %210, %209 : vector<4x32xf32>
    %212 = arith.divf %210, %211 : vector<4x32xf32>
    %213 = vector.extract_strided_slice %206 {offsets = [0, 32], sizes = [4, 32], strides = [1, 1]} : vector<4x128xf32> to vector<4x32xf32>
    %214 = arith.negf %213 : vector<4x32xf32>
    %215 = math.exp %214 : vector<4x32xf32>
    %cst_87 = arith.constant 1.000000e+00 : f32
    %216 = vector.broadcast %cst_87 : f32 to vector<4x32xf32>
    %217 = arith.addf %216, %215 : vector<4x32xf32>
    %218 = arith.divf %216, %217 : vector<4x32xf32>
    %219 = vector.extract_strided_slice %206 {offsets = [0, 64], sizes = [4, 32], strides = [1, 1]} : vector<4x128xf32> to vector<4x32xf32>
    %220 = math.tanh %219 : vector<4x32xf32>
    %221 = vector.extract_strided_slice %206 {offsets = [0, 96], sizes = [4, 32], strides = [1, 1]} : vector<4x128xf32> to vector<4x32xf32>
    %222 = arith.negf %221 : vector<4x32xf32>
    %223 = math.exp %222 : vector<4x32xf32>
    %cst_88 = arith.constant 1.000000e+00 : f32
    %224 = vector.broadcast %cst_88 : f32 to vector<4x32xf32>
    %225 = arith.addf %224, %223 : vector<4x32xf32>
    %226 = arith.divf %224, %225 : vector<4x32xf32>
    %227 = arith.mulf %218, %193 : vector<4x32xf32>
    %228 = arith.mulf %212, %220 : vector<4x32xf32>
    %229 = arith.addf %227, %228 : vector<4x32xf32>
    %230 = math.tanh %229 : vector<4x32xf32>
    %231 = arith.mulf %226, %230 : vector<4x32xf32>
    %232 = vector.extract_strided_slice %231 {offsets = [0, 0], sizes = [2, 32], strides = [1, 1]} : vector<4x32xf32> to vector<2x32xf32>
    %233 = vector.extract_strided_slice %231 {offsets = [2, 0], sizes = [2, 32], strides = [1, 1]} : vector<4x32xf32> to vector<2x32xf32>
    %c10_89 = arith.constant 10 : index
    %c0_90 = arith.constant 0 : index
    %234 = vector.load %arg7[%c10_89, %c0_90] : memref<16x64xf32, #tpu.memory_space<vmem>>, vector<2x32xf32>
    tpu.vector_store %arg7[%c10_89, %c0_90], %232 {strides = array<i32>} : memref<16x64xf32, #tpu.memory_space<vmem>>, vector<2x32xf32>,
    %c4_91 = arith.constant 4 : index
    %c32_92 = arith.constant 32 : index
    %235 = vector.load %arg7[%c4_91, %c32_92] : memref<16x64xf32, #tpu.memory_space<vmem>>, vector<2x32xf32>
    tpu.vector_store %arg7[%c4_91, %c32_92], %233 {strides = array<i32>} : memref<16x64xf32, #tpu.memory_space<vmem>>, vector<2x32xf32>,
    %cst_93 = arith.constant dense<0.000000e+00> : vector<2x128xf32>
    %236 = tpu.matmul %232, %8, %cst_93 {dimension_numbers = #tpu.dot_dimension_numbers<[1], [0], [0], [1], [0, 0, 1, 1], [], []>} : vector<2x32xf32>, vector<32x128xf32>, vector<2x128xf32> -> vector<2x128xf32>
    %c12_94 = arith.constant 12 : index
    %c0_95 = arith.constant 0 : index
    %237 = vector.load %arg8[%c12_94, %c0_95] : memref<16x256xf32, #tpu.memory_space<vmem>>, vector<2x128xf32>
    %238 = arith.addf %236, %237 : vector<2x128xf32>
    %cst_96 = arith.constant dense<0.000000e+00> : vector<2x128xf32>
    %239 = tpu.matmul %233, %10, %cst_96 {dimension_numbers = #tpu.dot_dimension_numbers<[1], [0], [0], [1], [0, 0, 1, 1], [], []>} : vector<2x32xf32>, vector<32x128xf32>, vector<2x128xf32> -> vector<2x128xf32>
    %c2_97 = arith.constant 2 : index
    %c128_98 = arith.constant 128 : index
    %240 = vector.load %arg8[%c2_97, %c128_98] : memref<16x256xf32, #tpu.memory_space<vmem>>, vector<2x128xf32>
    %241 = arith.addf %239, %240 : vector<2x128xf32>
    %242 = tpu.concatenate %238, %241 in 0 : vector<2x128xf32>, vector<2x128xf32> -> vector<4x128xf32>
    %243 = vector.extract_strided_slice %242 {offsets = [0, 0], sizes = [4, 32], strides = [1, 1]} : vector<4x128xf32> to vector<4x32xf32>
    %244 = arith.negf %243 : vector<4x32xf32>
    %245 = math.exp %244 : vector<4x32xf32>
    %cst_99 = arith.constant 1.000000e+00 : f32
    %246 = vector.broadcast %cst_99 : f32 to vector<4x32xf32>
    %247 = arith.addf %246, %245 : vector<4x32xf32>
    %248 = arith.divf %246, %247 : vector<4x32xf32>
    %249 = vector.extract_strided_slice %242 {offsets = [0, 32], sizes = [4, 32], strides = [1, 1]} : vector<4x128xf32> to vector<4x32xf32>
    %250 = arith.negf %249 : vector<4x32xf32>
    %251 = math.exp %250 : vector<4x32xf32>
    %cst_100 = arith.constant 1.000000e+00 : f32
    %252 = vector.broadcast %cst_100 : f32 to vector<4x32xf32>
    %253 = arith.addf %252, %251 : vector<4x32xf32>
    %254 = arith.divf %252, %253 : vector<4x32xf32>
    %255 = vector.extract_strided_slice %242 {offsets = [0, 64], sizes = [4, 32], strides = [1, 1]} : vector<4x128xf32> to vector<4x32xf32>
    %256 = math.tanh %255 : vector<4x32xf32>
    %257 = vector.extract_strided_slice %242 {offsets = [0, 96], sizes = [4, 32], strides = [1, 1]} : vector<4x128xf32> to vector<4x32xf32>
    %258 = arith.negf %257 : vector<4x32xf32>
    %259 = math.exp %258 : vector<4x32xf32>
    %cst_101 = arith.constant 1.000000e+00 : f32
    %260 = vector.broadcast %cst_101 : f32 to vector<4x32xf32>
    %261 = arith.addf %260, %259 : vector<4x32xf32>
    %262 = arith.divf %260, %261 : vector<4x32xf32>
    %263 = arith.mulf %254, %229 : vector<4x32xf32>
    %264 = arith.mulf %248, %256 : vector<4x32xf32>
    %265 = arith.addf %263, %264 : vector<4x32xf32>
    %266 = math.tanh %265 : vector<4x32xf32>
    %267 = arith.mulf %262, %266 : vector<4x32xf32>
    %268 = vector.extract_strided_slice %267 {offsets = [0, 0], sizes = [2, 32], strides = [1, 1]} : vector<4x32xf32> to vector<2x32xf32>
    %269 = vector.extract_strided_slice %267 {offsets = [2, 0], sizes = [2, 32], strides = [1, 1]} : vector<4x32xf32> to vector<2x32xf32>
    %c12_102 = arith.constant 12 : index
    %c0_103 = arith.constant 0 : index
    %270 = vector.load %arg7[%c12_102, %c0_103] : memref<16x64xf32, #tpu.memory_space<vmem>>, vector<2x32xf32>
    tpu.vector_store %arg7[%c12_102, %c0_103], %268 {strides = array<i32>} : memref<16x64xf32, #tpu.memory_space<vmem>>, vector<2x32xf32>,
    %c2_104 = arith.constant 2 : index
    %c32_105 = arith.constant 32 : index
    %271 = vector.load %arg7[%c2_104, %c32_105] : memref<16x64xf32, #tpu.memory_space<vmem>>, vector<2x32xf32>
    tpu.vector_store %arg7[%c2_104, %c32_105], %269 {strides = array<i32>} : memref<16x64xf32, #tpu.memory_space<vmem>>, vector<2x32xf32>,
    %cst_106 = arith.constant dense<0.000000e+00> : vector<2x128xf32>
    %272 = tpu.matmul %268, %8, %cst_106 {dimension_numbers = #tpu.dot_dimension_numbers<[1], [0], [0], [1], [0, 0, 1, 1], [], []>} : vector<2x32xf32>, vector<32x128xf32>, vector<2x128xf32> -> vector<2x128xf32>
    %c14_107 = arith.constant 14 : index
    %c0_108 = arith.constant 0 : index
    %273 = vector.load %arg8[%c14_107, %c0_108] : memref<16x256xf32, #tpu.memory_space<vmem>>, vector<2x128xf32>
    %274 = arith.addf %272, %273 : vector<2x128xf32>
    %cst_109 = arith.constant dense<0.000000e+00> : vector<2x128xf32>
    %275 = tpu.matmul %269, %10, %cst_109 {dimension_numbers = #tpu.dot_dimension_numbers<[1], [0], [0], [1], [0, 0, 1, 1], [], []>} : vector<2x32xf32>, vector<32x128xf32>, vector<2x128xf32> -> vector<2x128xf32>
    %c0_110 = arith.constant 0 : index
    %c128_111 = arith.constant 128 : index
    %276 = vector.load %arg8[%c0_110, %c128_111] : memref<16x256xf32, #tpu.memory_space<vmem>>, vector<2x128xf32>
    %277 = arith.addf %275, %276 : vector<2x128xf32>
    %278 = tpu.concatenate %274, %277 in 0 : vector<2x128xf32>, vector<2x128xf32> -> vector<4x128xf32>
    %279 = vector.extract_strided_slice %278 {offsets = [0, 0], sizes = [4, 32], strides = [1, 1]} : vector<4x128xf32> to vector<4x32xf32>
    %280 = arith.negf %279 : vector<4x32xf32>
    %281 = math.exp %280 : vector<4x32xf32>
    %cst_112 = arith.constant 1.000000e+00 : f32
    %282 = vector.broadcast %cst_112 : f32 to vector<4x32xf32>
    %283 = arith.addf %282, %281 : vector<4x32xf32>
    %284 = arith.divf %282, %283 : vector<4x32xf32>
    %285 = vector.extract_strided_slice %278 {offsets = [0, 32], sizes = [4, 32], strides = [1, 1]} : vector<4x128xf32> to vector<4x32xf32>
    %286 = arith.negf %285 : vector<4x32xf32>
    %287 = math.exp %286 : vector<4x32xf32>
    %cst_113 = arith.constant 1.000000e+00 : f32
    %288 = vector.broadcast %cst_113 : f32 to vector<4x32xf32>
    %289 = arith.addf %288, %287 : vector<4x32xf32>
    %290 = arith.divf %288, %289 : vector<4x32xf32>
    %291 = vector.extract_strided_slice %278 {offsets = [0, 64], sizes = [4, 32], strides = [1, 1]} : vector<4x128xf32> to vector<4x32xf32>
    %292 = math.tanh %291 : vector<4x32xf32>
    %293 = vector.extract_strided_slice %278 {offsets = [0, 96], sizes = [4, 32], strides = [1, 1]} : vector<4x128xf32> to vector<4x32xf32>
    %294 = arith.negf %293 : vector<4x32xf32>
    %295 = math.exp %294 : vector<4x32xf32>
    %cst_114 = arith.constant 1.000000e+00 : f32
    %296 = vector.broadcast %cst_114 : f32 to vector<4x32xf32>
    %297 = arith.addf %296, %295 : vector<4x32xf32>
    %298 = arith.divf %296, %297 : vector<4x32xf32>
    %299 = arith.mulf %290, %265 : vector<4x32xf32>
    %300 = arith.mulf %284, %292 : vector<4x32xf32>
    %301 = arith.addf %299, %300 : vector<4x32xf32>
    %302 = math.tanh %301 : vector<4x32xf32>
    %303 = arith.mulf %298, %302 : vector<4x32xf32>
    %304 = vector.extract_strided_slice %303 {offsets = [0, 0], sizes = [2, 32], strides = [1, 1]} : vector<4x32xf32> to vector<2x32xf32>
    %305 = vector.extract_strided_slice %303 {offsets = [2, 0], sizes = [2, 32], strides = [1, 1]} : vector<4x32xf32> to vector<2x32xf32>
    %c14_115 = arith.constant 14 : index
    %c0_116 = arith.constant 0 : index
    %306 = vector.load %arg7[%c14_115, %c0_116] : memref<16x64xf32, #tpu.memory_space<vmem>>, vector<2x32xf32>
    tpu.vector_store %arg7[%c14_115, %c0_116], %304 {strides = array<i32>} : memref<16x64xf32, #tpu.memory_space<vmem>>, vector<2x32xf32>,
    %c0_117 = arith.constant 0 : index
    %c32_118 = arith.constant 32 : index
    %307 = vector.load %arg7[%c0_117, %c32_118] : memref<16x64xf32, #tpu.memory_space<vmem>>, vector<2x32xf32>
    tpu.vector_store %arg7[%c0_117, %c32_118], %305 {strides = array<i32>} : memref<16x64xf32, #tpu.memory_space<vmem>>, vector<2x32xf32>,
    return
  }
  func.func @transform_0(%arg0: i32) -> (i32, i32) {
    %c0_i32 = arith.constant 0 : i32
    %c0_i32_0 = arith.constant 0 : i32
    %c0_i32_1 = arith.constant 0 : i32
    return %c0_i32, %c0_i32_0 : i32, i32
  }
  func.func @transform_1(%arg0: i32) -> (i32, i32) {
    %c0_i32 = arith.constant 0 : i32
    %c0_i32_0 = arith.constant 0 : i32
    %c0_i32_1 = arith.constant 0 : i32
    return %c0_i32, %c0_i32_0 : i32, i32
  }
  func.func @transform_2(%arg0: i32) -> (i32, i32, i32) {
    %c0_i32 = arith.constant 0 : i32
    %c0_i32_0 = arith.constant 0 : i32
    %c0_i32_1 = arith.constant 0 : i32
    %c0_i32_2 = arith.constant 0 : i32
    return %c0_i32, %c0_i32_0, %c0_i32_1 : i32, i32, i32
  }
  func.func @transform_3(%arg0: i32) -> (i32, i32) {
    %c0_i32 = arith.constant 0 : i32
    %c0_i32_0 = arith.constant 0 : i32
    %c0_i32_1 = arith.constant 0 : i32
    return %c0_i32, %c0_i32_0 : i32, i32
  }
  func.func @transform_4(%arg0: i32) -> (i32, i32, i32) {
    %c0_i32 = arith.constant 0 : i32
    %c0_i32_0 = arith.constant 0 : i32
    %c0_i32_1 = arith.constant 0 : i32
    %c0_i32_2 = arith.constant 0 : i32
    return %c0_i32, %c0_i32_0, %c0_i32_1 : i32, i32, i32
  }
  func.func @transform_5(%arg0: i32) -> (i32, i32, i32) {
    %c0_i32 = arith.constant 0 : i32
    %c0_i32_0 = arith.constant 0 : i32
    %c0_i32_1 = arith.constant 0 : i32
    %c0_i32_2 = arith.constant 0 : i32
    return %c0_i32, %c0_i32_0, %c0_i32_1 : i32, i32, i32
  }
  func.func @transform_6(%arg0: i32) -> (i32, i32) {
    %c0_i32 = arith.constant 0 : i32
    %c0_i32_0 = arith.constant 0 : i32
    %c0_i32_1 = arith.constant 0 : i32
    return %c0_i32, %c0_i32_0 : i32, i32
  }
}

</mosaic_0001>

<bundles_post_ra>
// kernel: tpu_custom_call.1
= control target key start
LH: loop header
LB: loop body
LE: loop exit
PB: predicated region body
PF: predicated region fallthrough
CT: control target
= control target key end

     0   :  { %11 = vsyncpa [#allocation4], 0  ;;  %s3189_s0 = inlined_call_operand.hbm [shape: f32[16,768], index: 0, kind: input, shape index: {}]   ;;  %s3190_s1 = inlined_call_operand.hbm [shape: f32[768,256], index: 1, kind: input, shape index: {}]   ;;  %s3191_s2 = inlined_call_operand.hbm [shape: f32[2,32,128], index: 2, kind: input, shape index: {}]   ;;  %s3192_s3 = inlined_call_operand.vmem [shape: f32[1,256], index: 3, kind: input, shape index: {}]   ;;  %s3193_s4 = inlined_call_operand.vmem [shape: f32[2,2,32], index: 4, kind: input, shape index: {}]   ;;  %s3194_s5 = inlined_call_operand.vmem [shape: f32[2,2,32], index: 5, kind: input, shape index: {}]   ;;  %s3195_s6 = inlined_call_operand.hbm [shape: f32[16,64], index: 6, kind: output, shape index: {}]  }
   0x1   :  { %12 = vsyncpa [#allocation7], 0 }
   0x2   :  { %13 = vsyncpa [#allocation5], 0  ;;  %s2839_s21 = smov [#allocation6]   ;;  %s2745_s25 = scalar_lea.hbm %s3190_s1, 24576 }
   0x3   :  { %s31_s22 = sshll.u32 %s2839_s21, 4  ;;  %p2746_p0 = scmp.ne.s32.totalorder %s3190_s1, %s2745_s25  ;;  %s32_s22 = int_to_ptr.vmem [resolvable:$true] %s31_s22 }
   0x4   :  { %p2749_p1 = scmp.lt.u32.totalorder %s2745_s25, %s3190_s1 }
   0x6   :  { %p2751_p2 = pnand %p2749_p1, %p2746_p0 }
   0x8   :  { %2754 = shalt.err (!%p2751_p2)
}
   0x9   :  { %s2755_s30 = scalar_lea.vmem %s32_s22, 24576  ;;  %p2760_p4 = scmp.lt.s32.totalorder %s32_s22, %s32_s22 }
   0xa   :  { %p2756_p3 = scmp.ne.s32.totalorder %s32_s22, %s2755_s30  ;;  %p2761_p5 = scmp.lt.s32.totalorder %s2755_s30, %s2755_s30 }
   0xc   :  { %p2762_p6 = por %p2761_p5, %p2760_p4 }
   0xe   :  { %p2763_p7 = pnand %p2762_p6, %p2756_p3 }
  0x10   :  { %2766 = shalt.err (!%p2763_p7)
}
  0x11   :  { %s2840_s7 = smov 256   ;;  %s2841_s8 = smov 16  }
  0x12   :  { %37 = dma.hbm_to_vmem [thread:$0]  %s3190_s1, 24576, %s32_s22, [#allocation7], %s2840_s7, %s2840_s7, %s2841_s8  }
  0x13   :  { %s2842_s11 = smov [#allocation3]   ;;  %s2767_s15 = scalar_lea.hbm %s3189_s0, 1536 }
  0x14   :  { %s19_s12 = sshll.u32 %s2842_s11, 4  ;;  %p2768_p8 = scmp.ne.s32.totalorder %s3189_s0, %s2767_s15  ;;  %s20_s12 = int_to_ptr.vmem [resolvable:$true] %s19_s12 }
  0x15   :  { %p2771_p9 = scmp.lt.u32.totalorder %s2767_s15, %s3189_s0 }
  0x17   :  { %p2773_p10 = pnand %p2771_p9, %p2768_p8 }
  0x19   :  { %2776 = shalt.err (!%p2773_p10)
}
  0x1a   :  { %s2777_s20 = scalar_lea.vmem %s20_s12, 1536  ;;  %p2782_p12 = scmp.lt.s32.totalorder %s20_s12, %s20_s12 }
  0x1b   :  { %p2778_p11 = scmp.ne.s32.totalorder %s20_s12, %s2777_s20  ;;  %p2783_p13 = scmp.lt.s32.totalorder %s2777_s20, %s2777_s20 }
  0x1d   :  { %p2784_p0 = por %p2783_p13, %p2782_p12 }
  0x1f   :  { %p2785_p1 = pnand %p2784_p0, %p2778_p11 }
  0x21   :  { %2788 = shalt.err (!%p2785_p1)
}
  0x22   :  { %s2843_s1 = smov 768   ;;  %s2844_s21 = smov 48  }
  0x23   :  { %25 = dma.hbm_to_vmem [thread:$0]  %s3189_s0, 1536, %s20_s12, [#allocation4], %s2843_s1, %s2843_s1, %s2844_s21  }
  0x24   :  { %s2845_s24 = smov [#allocation8]   ;;  %s2789_s28 = scalar_lea.hbm %s3191_s2, 1024 }
  0x25   :  { %s43_s25 = sshll.u32 %s2845_s24, 4  ;;  %p2790_p2 = scmp.ne.s32.totalorder %s3191_s2, %s2789_s28  ;;  %s44_s25 = int_to_ptr.vmem [resolvable:$true] %s43_s25 }
  0x26   :  { %p2793_p3 = scmp.lt.u32.totalorder %s2789_s28, %s3191_s2 }
  0x28   :  { %p2795_p4 = pnand %p2793_p3, %p2790_p2 }
  0x2a   :  { %2798 = shalt.err (!%p2795_p4)
}
  0x2b   :  { %s2799_s9 = scalar_lea.vmem %s44_s25, 1024  ;;  %p2804_p6 = scmp.lt.s32.totalorder %s44_s25, %s44_s25 }
  0x2c   :  { %p2800_p5 = scmp.ne.s32.totalorder %s44_s25, %s2799_s9  ;;  %p2805_p7 = scmp.lt.s32.totalorder %s2799_s9, %s2799_s9 }
  0x2e   :  { %p2806_p8 = por %p2805_p7, %p2804_p6 }
  0x30   :  { %p2807_p9 = pnand %p2806_p8, %p2800_p5 }
  0x32   :  { %2810 = shalt.err (!%p2807_p9)
}
  0x33   :  { %s2846_s0 = smov 128   ;;  %s2847_s10 = smov 8  }
  0x34   :  { %49 = dma.hbm_to_vmem [thread:$0]  %s3191_s2, 1024, %s44_s25, [#allocation7], %s2846_s0, %s2846_s0, %s2847_s10  }
  0x35   :  { %2833 = dma.done.wait [#allocation4], 1536  }
  0x36   :  { %2834 = vsyncadd [#allocation4], 4294965760 }
  0x37   :  { %2835 = dma.done.wait [#allocation7], 25600  }
  0x38   :  { %2836 = vsyncadd [#allocation7], 4294941696  ;;  %v142_v0 = vld [vmem:[#allocation6 + $0x208] sm:$0xff]  ;;  %v144_v1 = vld [vmem:[#allocation6 + $0x218] sm:$0xff]  ;;  %vm2849_vm0 = vmmov 0   ;;  %vm537_vm1 = vcmask 261120  }
  0x39   :  { %v141_v2 = vld [vmem:[#allocation6 + $0x200] sm:$0xff]  ;;  %v2430_v3 = vpack.c.bf16 %v144_v1, %v142_v0  ;;  %v143_v4 = vld [vmem:[#allocation6 + $0x210] sm:$0xff]  ;;  %v146_v5 = vld [vmem:[#allocation6 + $0x228] sm:$0xff]  ;;  %vm534_vm2 = vcmask 1041408   ;;  %s2851_s20 = smov 64   ;;  %s2852_s1 = smov 32  }
  0x3a   :  { %v148_v6 = vld [vmem:[#allocation6 + $0x238] sm:$0xff]  ;;  %v2432_v7 = vpack.c.bf16 %v143_v4, %v141_v2  ;;  %v145_v9 = vld [vmem:[#allocation6 + $0x220] sm:$0xff]  ;;  %v147_v10 = vld [vmem:[#allocation6 + $0x230] sm:$0xff]  ;;  %vm724_vm3 = vcmask 254976   ;;  %vm729_vm4 = vcmask 519426  }
  0x3b   :  { %v2434_v8 = vpack.c.bf16 %v148_v6, %v146_v5  ;;  %v150_v11 = vld [vmem:[#allocation6 + $0x248] sm:$0xff]  ;;  %2431 = vmatprep.subr.bf16.mxu0 %v2430_v3  ;;  %v152_v12 = vld [vmem:[#allocation6 + $0x258] sm:$0xff]  ;;  %v2436_v13 = vpack.c.bf16 %v147_v10, %v145_v9  ;;  %v149_v15 = vld [vmem:[#allocation6 + $0x240] sm:$0xff] }
  0x3c   :  { %2433 = vmatpush1.bf16.msra.mxu0 %v2432_v7  ;;  %v2438_v14 = vpack.c.bf16 %v152_v12, %v150_v11  ;;  %v151_v16 = vld [vmem:[#allocation6 + $0x250] sm:$0xff]  ;;  %v154_v17 = vld [vmem:[#allocation6 + $0x268] sm:$0xff]  ;;  %v156_v18 = vld [vmem:[#allocation6 + $0x278] sm:$0xff] }
  0x3d   :  { %2435 = vmatprep.subr.bf16.mxu0 %v2434_v8  ;;  %v2440_v19 = vpack.c.bf16 %v151_v16, %v149_v15  ;;  %v2442_v20 = vpack.c.bf16 %v156_v18, %v154_v17  ;;  %v153_v21 = vld [vmem:[#allocation6 + $0x260] sm:$0xff]  ;;  %v155_v22 = vld [vmem:[#allocation6 + $0x270] sm:$0xff]  ;;  %v158_v23 = vld [vmem:[#allocation6 + $0x288] sm:$0xff] }
  0x3e   :  { %v160_v24 = vld [vmem:[#allocation6 + $0x298] sm:$0xff]  ;;  %v2444_v25 = vpack.c.bf16 %v155_v22, %v153_v21  ;;  %v157_v27 = vld [vmem:[#allocation6 + $0x280] sm:$0xff]  ;;  %v159_v28 = vld [vmem:[#allocation6 + $0x290] sm:$0xff] }
  0x3f   :  { %v2446_v26 = vpack.c.bf16 %v160_v24, %v158_v23  ;;  %v162_v29 = vld [vmem:[#allocation6 + $0x2a8] sm:$0xff]  ;;  %v164_v30 = vld [vmem:[#allocation6 + $0x2b8] sm:$0xff]  ;;  %v2448_v31 = vpack.c.bf16 %v159_v28, %v157_v27  ;;  %v161_v33 = vld [vmem:[#allocation6 + $0x2a0] sm:$0xff] }
  0x40   :  { %2437 = vmatpush1.bf16.msra.mxu0 %v2436_v13  ;;  %v2450_v32 = vpack.c.bf16 %v164_v30, %v162_v29  ;;  %v163_v34 = vld [vmem:[#allocation6 + $0x2b0] sm:$0xff]  ;;  %v166_v35 = vld [vmem:[#allocation6 + $0x2c8] sm:$0xff]  ;;  %v168_v36 = vld [vmem:[#allocation6 + $0x2d8] sm:$0xff] }
  0x41   :  { %2439 = vmatprep.subr.bf16.mxu0 %v2438_v14  ;;  %v2452_v37 = vpack.c.bf16 %v163_v34, %v161_v33  ;;  %v165_v38 = vld [vmem:[#allocation6 + $0x2c0] sm:$0xff]  ;;  %v167_v39 = vld [vmem:[#allocation6 + $0x2d0] sm:$0xff]  ;;  %v78_v40 = vld [vmem:[#allocation6 + $0x8] sm:$0xff]  ;;  %v2454_v41 = vpack.c.bf16 %v168_v36, %v166_v35 }
  0x42   :  { %v170_v42 = vld [vmem:[#allocation6 + $0x2e8] sm:$0xff]  ;;  %v172_v43 = vld [vmem:[#allocation6 + $0x2f8] sm:$0xff]  ;;  %v77_v46 = vld [vmem:[#allocation6] sm:$0xff]  ;;  %v2456_v51 = vpack.c.bf16 %v167_v39, %v165_v38 }
  0x43   :  { %v80_v44 = vld [vmem:[#allocation6 + $0x18] sm:$0xff]  ;;  %v79_v47 = vld [vmem:[#allocation6 + $0x10] sm:$0xff]  ;;  %v82_v50 = vld [vmem:[#allocation6 + $0x28] sm:$0xff]  ;;  %v2458_v54 = vpack.c.bf16 %v172_v43, %v170_v42 }
  0x44   :  { %2441 = vmatpush1.bf16.msra.mxu0 %v2440_v19  ;;  %v2366_v45 = vpack.c.bf16 %v80_v44, %v78_v40  ;;  %v68_v48 = vld [vmem:[#allocation3 + $0x18] sm:$0xff]  ;;  %v2368_v49 = vpack.c.bf16 %v79_v47, %v77_v46  ;;  %v169_v52 = vld [vmem:[#allocation6 + $0x2e0] sm:$0xff]  ;;  %v171_v55 = vld [vmem:[#allocation6 + $0x2f0] sm:$0xff] }
  0x45   :  { %2443 = vmatprep.subr.bf16.mxu0 %v2442_v20  ;;  %422 = vmatprep.mubr.f32.mxu0 %v68_v48  ;;  %v84_v53 = vld [vmem:[#allocation6 + $0x38] sm:$0xff]  ;;  %v81_v57 = vld [vmem:[#allocation6 + $0x20] sm:$0xff]  ;;  %v83_v58 = vld [vmem:[#allocation6 + $0x30] sm:$0xff]  ;;  %v2460_v0 = vpack.c.bf16 %v171_v55, %v169_v52 }
  0x46   :  { %2367 = vmatprep.subr.bf16.mxu1 %v2366_v45  ;;  %v2370_v56 = vpack.c.bf16 %v84_v53, %v82_v50  ;;  %v174_v59 = vld [vmem:[#allocation6 + $0x308] sm:$0xff]  ;;  %v176_v60 = vld [vmem:[#allocation6 + $0x318] sm:$0xff]  ;;  %v2372_v61 = vpack.c.bf16 %v83_v58, %v81_v57  ;;  %v173_v1 = vld [vmem:[#allocation6 + $0x300] sm:$0xff] }
  0x47   :  { %2369 = vmatpush1.bf16.msra.mxu1 %v2368_v49  ;;  %v86_v62 = vld [vmem:[#allocation6 + $0x48] sm:$0xff]  ;;  %v88_v63 = vld [vmem:[#allocation6 + $0x58] sm:$0xff]  ;;  %v85_v3 = vld [vmem:[#allocation6 + $0x40] sm:$0xff]  ;;  %v2462_v5 = vpack.c.bf16 %v176_v60, %v174_v59 }
  0x48   :  { %2445 = vmatpush1.bf16.msra.mxu0 %v2444_v25  ;;  %2371 = vmatprep.subr.bf16.mxu1 %v2370_v56  ;;  %v2374_v2 = vpack.c.bf16 %v88_v63, %v86_v62  ;;  %v87_v4 = vld [vmem:[#allocation6 + $0x50] sm:$0xff]  ;;  %v90_v8 = vld [vmem:[#allocation6 + $0x68] sm:$0xff]  ;;  %v92_v9 = vld [vmem:[#allocation6 + $0x78] sm:$0xff] }
  0x49   :  { %2447 = vmatprep.subr.bf16.mxu0 %v2446_v26  ;;  %v175_v6 = vld [vmem:[#allocation6 + $0x310] sm:$0xff]  ;;  %v2376_v7 = vpack.c.bf16 %v87_v4, %v85_v3  ;;  %v178_v10 = vld [vmem:[#allocation6 + $0x328] sm:$0xff]  ;;  %v180_v11 = vld [vmem:[#allocation6 + $0x338] sm:$0xff]  ;;  %v2378_v12 = vpack.c.bf16 %v92_v9, %v90_v8 }
  0x4a   :  { %v89_v13 = vld [vmem:[#allocation6 + $0x60] sm:$0xff]  ;;  %v91_v14 = vld [vmem:[#allocation6 + $0x70] sm:$0xff]  ;;  %v2464_v15 = vpack.c.bf16 %v175_v6, %v173_v1  ;;  %v94_v16 = vld [vmem:[#allocation6 + $0x88] sm:$0xff]  ;;  %v2466_v18 = vpack.c.bf16 %v180_v11, %v178_v10 }
  0x4b   :  { %2373 = vmatpush1.bf16.msra.mxu1 %v2372_v61  ;;  %v96_v17 = vld [vmem:[#allocation6 + $0x98] sm:$0xff]  ;;  %v177_v19 = vld [vmem:[#allocation6 + $0x320] sm:$0xff]  ;;  %v179_v20 = vld [vmem:[#allocation6 + $0x330] sm:$0xff]  ;;  %v2380_v22 = vpack.c.bf16 %v91_v14, %v89_v13 }
  0x4c   :  { %2449 = vmatpush1.bf16.msra.mxu0 %v2448_v31  ;;  %2375 = vmatprep.subr.bf16.mxu1 %v2374_v2  ;;  %v182_v21 = vld [vmem:[#allocation6 + $0x348] sm:$0xff]  ;;  %v184_v23 = vld [vmem:[#allocation6 + $0x358] sm:$0xff]  ;;  %v2382_v24 = vpack.c.bf16 %v96_v17, %v94_v16  ;;  %v93_v25 = vld [vmem:[#allocation6 + $0x80] sm:$0xff]  ;;  %v2468_v29 = vpack.c.bf16 %v179_v20, %v177_v19 }
  0x4d   :  { %2451 = vmatprep.subr.bf16.mxu0 %v2450_v32  ;;  %v95_v26 = vld [vmem:[#allocation6 + $0x90] sm:$0xff]  ;;  %v98_v27 = vld [vmem:[#allocation6 + $0xa8] sm:$0xff]  ;;  %v100_v28 = vld [vmem:[#allocation6 + $0xb8] sm:$0xff]  ;;  %v2470_v30 = vpack.c.bf16 %v184_v23, %v182_v21 }
  0x4e   :  { %v181_v31 = vld [vmem:[#allocation6 + $0x340] sm:$0xff]  ;;  %v183_v32 = vld [vmem:[#allocation6 + $0x350] sm:$0xff]  ;;  %v186_v33 = vld [vmem:[#allocation6 + $0x368] sm:$0xff]  ;;  %v2384_v34 = vpack.c.bf16 %v95_v26, %v93_v25  ;;  %v2386_v36 = vpack.c.bf16 %v100_v28, %v98_v27 }
  0x4f   :  { %2377 = vmatpush1.bf16.msra.mxu1 %v2376_v7  ;;  %v188_v35 = vld [vmem:[#allocation6 + $0x378] sm:$0xff]  ;;  %v99_v38 = vld [vmem:[#allocation6 + $0xb0] sm:$0xff]  ;;  %v102_v39 = vld [vmem:[#allocation6 + $0xc8] sm:$0xff] }
  0x50   :  { %2453 = vmatpush1.bf16.msra.mxu0 %v2452_v37  ;;  %2379 = vmatprep.subr.bf16.mxu1 %v2378_v12  ;;  %v97_v37 = vld [vmem:[#allocation6 + $0xa0] sm:$0xff]  ;;  %v104_v40 = vld [vmem:[#allocation6 + $0xd8] sm:$0xff]  ;;  %v2474_v42 = vpack.c.bf16 %v188_v35, %v186_v33  ;;  %v187_v44 = vld [vmem:[#allocation6 + $0x370] sm:$0xff] }
  0x51   :  { %2455 = vmatprep.subr.bf16.mxu0 %v2454_v41  ;;  %v2472_v41 = vpack.c.bf16 %v183_v32, %v181_v31  ;;  %v185_v43 = vld [vmem:[#allocation6 + $0x360] sm:$0xff]  ;;  %v190_v45 = vld [vmem:[#allocation6 + $0x388] sm:$0xff]  ;;  %v2388_v46 = vpack.c.bf16 %v99_v38, %v97_v37  ;;  %v192_v47 = vld [vmem:[#allocation6 + $0x398] sm:$0xff]  ;;  %v2390_v48 = vpack.c.bf16 %v104_v40, %v102_v39 }
  0x52   :  { %v101_v49 = vld [vmem:[#allocation6 + $0xc0] sm:$0xff]  ;;  %v103_v50 = vld [vmem:[#allocation6 + $0xd0] sm:$0xff]  ;;  %v108_v52 = vld [vmem:[#allocation6 + $0xf8] sm:$0xff]  ;;  %v2476_v53 = vpack.c.bf16 %v187_v44, %v185_v43 }
  0x53   :  { %2381 = vmatpush1.bf16.msra.mxu1 %v2380_v22  ;;  %v189_v55 = vld [vmem:[#allocation6 + $0x380] sm:$0xff]  ;;  %v191_v56 = vld [vmem:[#allocation6 + $0x390] sm:$0xff]  ;;  %v194_v57 = vld [vmem:[#allocation6 + $0x3a8] sm:$0xff]  ;;  %v2392_v58 = vpack.c.bf16 %v103_v50, %v101_v49 }
  0x54   :  { %2457 = vmatpush1.bf16.msra.mxu0 %v2456_v51  ;;  %2383 = vmatprep.subr.bf16.mxu1 %v2382_v24  ;;  %v106_v51 = vld [vmem:[#allocation6 + $0xe8] sm:$0xff]  ;;  %v196_v59 = vld [vmem:[#allocation6 + $0x3b8] sm:$0xff]  ;;  %v105_v61 = vld [vmem:[#allocation6 + $0xe0] sm:$0xff]  ;;  %v2480_v1 = vpack.c.bf16 %v191_v56, %v189_v55 }
  0x55   :  { %2459 = vmatprep.subr.bf16.mxu0 %v2458_v54  ;;  %v2478_v54 = vpack.c.bf16 %v192_v47, %v190_v45  ;;  %v2394_v60 = vpack.c.bf16 %v108_v52, %v106_v51  ;;  %v107_v62 = vld [vmem:[#allocation6 + $0xf0] sm:$0xff]  ;;  %v110_v63 = vld [vmem:[#allocation6 + $0x108] sm:$0xff]  ;;  %v2482_v2 = vpack.c.bf16 %v196_v59, %v194_v57  ;;  %v193_v3 = vld [vmem:[#allocation6 + $0x3a0] sm:$0xff] }
  0x56   :  { %v195_v4 = vld [vmem:[#allocation6 + $0x3b0] sm:$0xff]  ;;  %v2396_v6 = vpack.c.bf16 %v107_v62, %v105_v61  ;;  %v200_v7 = vld [vmem:[#allocation6 + $0x3d8] sm:$0xff]  ;;  %v109_v9 = vld [vmem:[#allocation6 + $0x100] sm:$0xff] }
  0x57   :  { %2385 = vmatpush1.bf16.msra.mxu1 %v2384_v34  ;;  %v111_v10 = vld [vmem:[#allocation6 + $0x110] sm:$0xff]  ;;  %v114_v11 = vld [vmem:[#allocation6 + $0x128] sm:$0xff]  ;;  %v116_v12 = vld [vmem:[#allocation6 + $0x138] sm:$0xff]  ;;  %v2484_v13 = vpack.c.bf16 %v195_v4, %v193_v3 }
  0x58   :  { %2461 = vmatpush1.bf16.msra.mxu0 %v2460_v0  ;;  %2387 = vmatprep.subr.bf16.mxu1 %v2386_v36  ;;  %v112_v0 = vld [vmem:[#allocation6 + $0x118] sm:$0xff]  ;;  %v199_v16 = vld [vmem:[#allocation6 + $0x3d0] sm:$0xff]  ;;  %v202_v17 = vld [vmem:[#allocation6 + $0x3e8] sm:$0xff]  ;;  %v2402_v20 = vpack.c.bf16 %v116_v12, %v114_v11 }
  0x59   :  { %2463 = vmatprep.subr.bf16.mxu0 %v2462_v5  ;;  %v198_v5 = vld [vmem:[#allocation6 + $0x3c8] sm:$0xff]  ;;  %v2398_v8 = vpack.c.bf16 %v112_v0, %v110_v63  ;;  %v204_v19 = vld [vmem:[#allocation6 + $0x3f8] sm:$0xff]  ;;  %v113_v21 = vld [vmem:[#allocation6 + $0x120] sm:$0xff] }
  0x5a   :  { %v2486_v14 = vpack.c.bf16 %v200_v7, %v198_v5  ;;  %v115_v22 = vld [vmem:[#allocation6 + $0x130] sm:$0xff]  ;;  %v118_v23 = vld [vmem:[#allocation6 + $0x148] sm:$0xff]  ;;  %v120_v24 = vld [vmem:[#allocation6 + $0x158] sm:$0xff]  ;;  %v2490_v26 = vpack.c.bf16 %v204_v19, %v202_v17 }
  0x5b   :  { %2389 = vmatpush1.bf16.msra.mxu1 %v2388_v46  ;;  %v201_v27 = vld [vmem:[#allocation6 + $0x3e0] sm:$0xff]  ;;  %v203_v28 = vld [vmem:[#allocation6 + $0x3f0] sm:$0xff]  ;;  %v208_v31 = vld [vmem:[#allocation6 + $0x418] sm:$0xff]  ;;  %v2406_v32 = vpack.c.bf16 %v120_v24, %v118_v23 }
  0x5c   :  { %2465 = vmatpush1.bf16.msra.mxu0 %v2464_v15  ;;  %2391 = vmatprep.subr.bf16.mxu1 %v2390_v48  ;;  %v197_v15 = vld [vmem:[#allocation6 + $0x3c0] sm:$0xff]  ;;  %v119_v34 = vld [vmem:[#allocation6 + $0x150] sm:$0xff]  ;;  %v122_v35 = vld [vmem:[#allocation6 + $0x168] sm:$0xff]  ;;  %v2492_v37 = vpack.c.bf16 %v203_v28, %v201_v27 }
  0x5d   :  { %2467 = vmatprep.subr.bf16.mxu0 %v2466_v18  ;;  %v2400_v18 = vpack.c.bf16 %v111_v10, %v109_v9  ;;  %v2488_v25 = vpack.c.bf16 %v199_v16, %v197_v15  ;;  %v117_v33 = vld [vmem:[#allocation6 + $0x140] sm:$0xff]  ;;  %v124_v36 = vld [vmem:[#allocation6 + $0x178] sm:$0xff]  ;;  %v207_v40 = vld [vmem:[#allocation6 + $0x410] sm:$0xff] }
  0x5e   :  { %v205_v39 = vld [vmem:[#allocation6 + $0x400] sm:$0xff]  ;;  %v212_v43 = vld [vmem:[#allocation6 + $0x438] sm:$0xff]  ;;  %v2410_v44 = vpack.c.bf16 %v124_v36, %v122_v35  ;;  %v123_v46 = vld [vmem:[#allocation6 + $0x170] sm:$0xff] }
  0x5f   :  { %2393 = vmatpush1.bf16.msra.mxu1 %v2392_v58  ;;  %v121_v45 = vld [vmem:[#allocation6 + $0x160] sm:$0xff]  ;;  %v126_v47 = vld [vmem:[#allocation6 + $0x188] sm:$0xff]  ;;  %v128_v48 = vld [vmem:[#allocation6 + $0x198] sm:$0xff]  ;;  %v2496_v51 = vpack.c.bf16 %v207_v40, %v205_v39 }
  0x60   :  { %2469 = vmatpush1.bf16.msra.mxu0 %v2468_v29  ;;  %2395 = vmatprep.subr.bf16.mxu1 %v2394_v60  ;;  %v206_v29 = vld [vmem:[#allocation6 + $0x408] sm:$0xff]  ;;  %v67_v50 = vld [vmem:[#allocation3 + $0x10] sm:$0xff]  ;;  %v209_v52 = vld [vmem:[#allocation6 + $0x420] sm:$0xff]  ;;  %v2412_v56 = vpack.c.bf16 %v123_v46, %v121_v45  ;;  %v2414_v59 = vpack.c.bf16 %v128_v48, %v126_v47 }
  0x61   :  { %2471 = vmatprep.subr.bf16.mxu0 %v2470_v30  ;;  %v2404_v30 = vpack.c.bf16 %v115_v22, %v113_v21  ;;  %v2494_v38 = vpack.c.bf16 %v208_v31, %v206_v29  ;;  %v66_v49 = vld [vmem:[#allocation3 + $0x8] sm:$0xff]  ;;  %v216_v58 = vld [vmem:[#allocation6 + $0x458] sm:$0xff]  ;;  %v125_v60 = vld [vmem:[#allocation6 + $0x180] sm:$0xff] }
  0x62   :  { %345 = vmatprep.mubr.f32.mxu1 %v66_v49  ;;  %v214_v55 = vld [vmem:[#allocation6 + $0x448] sm:$0xff]  ;;  %v127_v61 = vld [vmem:[#allocation6 + $0x190] sm:$0xff]  ;;  %v132_v63 = vld [vmem:[#allocation6 + $0x1b8] sm:$0xff] }
  0x63   :  { %2397 = vmatpush1.bf16.msra.mxu1 %v2396_v6  ;;  %v74_v57 = vld [vmem:[#allocation3 + $0x48] sm:$0xff]  ;;  %v2502_v3 = vpack.c.bf16 %v216_v58, %v214_v55  ;;  %v215_v4 = vld [vmem:[#allocation6 + $0x450] sm:$0xff]  ;;  %v2416_v6 = vpack.c.bf16 %v127_v61, %v125_v60  ;;  %v129_v10 = vld [vmem:[#allocation6 + $0x1a0] sm:$0xff] }
  0x64   :  { %2473 = vmatpush1.bf16.msra.mxu0 %v2472_v41  ;;  %2399 = vmatprep.subr.bf16.mxu1 %v2398_v8  ;;  %v210_v41 = vld [vmem:[#allocation6 + $0x428] sm:$0xff]  ;;  %v220_v8 = vld [vmem:[#allocation6 + $0x478] sm:$0xff]  ;;  %v131_v11 = vld [vmem:[#allocation6 + $0x1b0] sm:$0xff] }
  0x65   :  { %2475 = vmatprep.subr.bf16.mxu0 %v2474_v42  ;;  %v2408_v42 = vpack.c.bf16 %v119_v34, %v117_v33  ;;  %v130_v62 = vld [vmem:[#allocation6 + $0x1a8] sm:$0xff]  ;;  %v217_v16 = vld [vmem:[#allocation6 + $0x460] sm:$0xff]  ;;  %v219_v17 = vld [vmem:[#allocation6 + $0x470] sm:$0xff]  ;;  %v2420_v19 = vpack.c.bf16 %v131_v11, %v129_v10 }
  0x66   :  { %v218_v5 = vld [vmem:[#allocation6 + $0x468] sm:$0xff]  ;;  %v2418_v9 = vpack.c.bf16 %v132_v63, %v130_v62  ;;  %v133_v22 = vld [vmem:[#allocation6 + $0x1c0] sm:$0xff]  ;;  %v135_v23 = vld [vmem:[#allocation6 + $0x1d0] sm:$0xff] }
  0x67   :  { %2401 = vmatpush1.bf16.msra.mxu1 %v2400_v18  ;;  %v70_v7 = vld [vmem:[#allocation3 + $0x28] sm:$0xff]  ;;  %v2506_v15 = vpack.c.bf16 %v220_v8, %v218_v5  ;;  %v221_v28 = vld [vmem:[#allocation6 + $0x480] sm:$0xff]  ;;  %v223_v29 = vld [vmem:[#allocation6 + $0x490] sm:$0xff]  ;;  %v2424_v31 = vpack.c.bf16 %v135_v23, %v133_v22  ;;  %v2850_v5 = vmov 0.0  }
  0x68   :  { %2477 = vmatpush1.bf16.msra.mxu0 %v2476_v53  ;;  %2403 = vmatprep.subr.bf16.mxu1 %v2402_v20  ;;  %v2498_v53 = vpack.c.bf16 %v212_v43, %v210_v41  ;;  %v134_v12 = vld [vmem:[#allocation6 + $0x1c8] sm:$0xff]  ;;  %v224_v20 = vld [vmem:[#allocation6 + $0x498] sm:$0xff]  ;;  %v137_v34 = vld [vmem:[#allocation6 + $0x1e0] sm:$0xff]  ;;  %v2512_v36 = vpack.c.bf16 %v223_v29, %v221_v28 }
  0x69   :  { %2479 = vmatprep.subr.bf16.mxu0 %v2478_v54  ;;  %v211_v54 = vld [vmem:[#allocation6 + $0x430] sm:$0xff]  ;;  %v222_v18 = vld [vmem:[#allocation6 + $0x488] sm:$0xff]  ;;  %v65_v47 = vld [vmem:[#allocation3] sm:$0xff] }
  0x6a   :  { %v2500_v0 = vpack.c.bf16 %v211_v54, %v209_v52  ;;  %v138_v24 = vld [vmem:[#allocation6 + $0x1e8] sm:$0xff]  ;;  %v2510_v27 = vpack.c.bf16 %v224_v20, %v222_v18  ;;  %v139_v35 = vld [vmem:[#allocation6 + $0x1f0] sm:$0xff]  ;;  %v516_v48 = vld [vmem:[#allocation8] sm:$0xff] }
  0x6b   :  { %2405 = vmatpush1.bf16.msra.mxu1 %v2404_v30  ;;  %v226_v30 = vld [vmem:[#allocation6 + $0x4a8] sm:$0xff]  ;;  %v227_v39 = vld [vmem:[#allocation6 + $0x4b0] sm:$0xff]  ;;  %v2428_v40 = vpack.c.bf16 %v139_v35, %v137_v34  ;;  %v72_v52 = vld [vmem:[#allocation3 + $0x38] sm:$0xff] }
  0x6c   :  { %2481 = vmatpush1.bf16.msra.mxu0 %v2480_v1  ;;  %2407 = vmatprep.subr.bf16.mxu1 %v2406_v32  ;;  %v213_v1 = vld [vmem:[#allocation6 + $0x440] sm:$0xff]  ;;  %v228_v32 = vld [vmem:[#allocation6 + $0x4b8] sm:$0xff]  ;;  %v230_v41 = vld [vmem:[#allocation6 + $0x4c8] sm:$0xff] }
  0x6d   :  { %2483 = vmatprep.subr.bf16.mxu0 %v2482_v2  ;;  %v73_v2 = vld [vmem:[#allocation3 + $0x40] sm:$0xff]  ;;  %v231_v45 = vld [vmem:[#allocation6 + $0x4d0] sm:$0xff]  ;;  %v517_v49 = vld [vmem:[#allocation8 + $0x8] sm:$0xff] }
  0x6e   :  { %v233_v55 = vld [vmem:[#allocation6 + $0x4e0] sm:$0xff]  ;;  %v518_v60 = vld [vmem:[#allocation8 + $0x10] sm:$0xff]  ;;  %v519_v61 = vld [vmem:[#allocation8 + $0x18] sm:$0xff] }
  0x6f   :  { %2409 = vmatpush1.bf16.msra.mxu1 %v2408_v42  ;;  %v232_v42 = vld [vmem:[#allocation6 + $0x4d8] sm:$0xff]  ;;  %v238_v62 = vld [vmem:[#allocation6 + $0x508] sm:$0xff]  ;;  %v241_v10 = vld [vmem:[#allocation6 + $0x520] sm:$0xff] }
  0x70   :  { %2485 = vmatpush1.bf16.msra.mxu0 %v2484_v13  ;;  %2411 = vmatprep.subr.bf16.mxu1 %v2410_v44  ;;  %v136_v13 = vld [vmem:[#allocation6 + $0x1d8] sm:$0xff]  ;;  %v229_v44 = vld [vmem:[#allocation6 + $0x4c0] sm:$0xff]  ;;  %v2518_v46 = vpack.c.bf16 %v232_v42, %v230_v41  ;;  %v243_v11 = vld [vmem:[#allocation6 + $0x530] sm:$0xff] }
  0x71   :  { %2487 = vmatprep.subr.bf16.mxu0 %v2486_v14  ;;  %v2504_v14 = vpack.c.bf16 %v215_v4, %v213_v1  ;;  %v2422_v21 = vpack.c.bf16 %v136_v13, %v134_v12  ;;  %v2520_v54 = vpack.c.bf16 %v231_v45, %v229_v44  ;;  %v240_v63 = vld [vmem:[#allocation6 + $0x518] sm:$0xff]  ;;  %v2933_v1 = vpack.c.bf16 %v519_v61, %v518_v60  ;;  %v239_v4 = vld [vmem:[#allocation6 + $0x510] sm:$0xff]  ;;  %v246_v12 = vld [vmem:[#allocation6 + $0x548] sm:$0xff] }
  0x72   :  { %v248_v13 = vld [vmem:[#allocation6 + $0x558] sm:$0xff]  ;;  %v250_v18 = vld [vmem:[#allocation6 + $0x568] sm:$0xff]  ;;  %v249_v22 = vld [vmem:[#allocation6 + $0x560] sm:$0xff] }
  0x73   :  { %2413 = vmatpush1.bf16.msra.mxu1 %v2412_v56  ;;  %v235_v56 = vld [vmem:[#allocation6 + $0x4f0] sm:$0xff]  ;;  %v253_v28 = vld [vmem:[#allocation6 + $0x580] sm:$0xff]  ;;  %v266_v42 = vld [vmem:[#allocation6 + $0x5e8] sm:$0xff] }
  0x74   :  { %2489 = vmatpush1.bf16.msra.mxu0 %v2488_v25  ;;  %2415 = vmatprep.subr.bf16.mxu1 %v2414_v59  ;;  %v140_v25 = vld [vmem:[#allocation6 + $0x1f8] sm:$0xff]  ;;  %v71_v59 = vld [vmem:[#allocation3 + $0x30] sm:$0xff]  ;;  %v257_v34 = vld [vmem:[#allocation6 + $0x5a0] sm:$0xff] }
  0x75   :  { %2491 = vmatprep.subr.bf16.mxu0 %v2490_v26  ;;  %v2508_v26 = vpack.c.bf16 %v219_v17, %v217_v16  ;;  %v2426_v33 = vpack.c.bf16 %v140_v25, %v138_v24  ;;  %v245_v16 = vld [vmem:[#allocation6 + $0x540] sm:$0xff]  ;;  %v247_v17 = vld [vmem:[#allocation6 + $0x550] sm:$0xff]  ;;  %v254_v24 = vld [vmem:[#allocation6 + $0x588] sm:$0xff] }
  0x76   :  { %v2536_v20 = vpack.c.bf16 %v247_v17, %v245_v16  ;;  %v251_v23 = vld [vmem:[#allocation6 + $0x570] sm:$0xff]  ;;  %v256_v25 = vld [vmem:[#allocation6 + $0x598] sm:$0xff]  ;;  %v2084_v61 = vld [vmem:[%s3193_s4 + $0x2] sm:$0x3] }
  0x77   :  { %2417 = vmatpush1.bf16.msra.mxu1 %v2416_v6  ;;  %v242_v6 = vld [vmem:[#allocation6 + $0x528] sm:$0xff]  ;;  %v255_v29 = vld [vmem:[#allocation6 + $0x590] sm:$0xff] }
  0x78   :  { %2493 = vmatpush1.bf16.msra.mxu0 %v2492_v37  ;;  %2419 = vmatprep.subr.bf16.mxu1 %v2418_v9  ;;  %v2514_v37 = vpack.c.bf16 %v228_v32, %v226_v30  ;;  %v258_v30 = vld [vmem:[#allocation6 + $0x5a8] sm:$0xff]  ;;  %v2544_v32 = vpack.c.bf16 %v255_v29, %v253_v28  ;;  %v259_v35 = vld [vmem:[#allocation6 + $0x5b0] sm:$0xff] }
  0x79   :  { %2495 = vmatprep.subr.bf16.mxu0 %v2494_v38  ;;  %v225_v38 = vld [vmem:[#allocation6 + $0x4a0] sm:$0xff]  ;;  %v263_v41 = vld [vmem:[#allocation6 + $0x5d0] sm:$0xff] }
  0x7a   :  { %v2516_v43 = vpack.c.bf16 %v227_v39, %v225_v38  ;;  %v2548_v38 = vpack.c.bf16 %v259_v35, %v257_v34  ;;  %v2085_v34 = vld [vmem:[%s3194_s5 + $0x2] sm:$0x3] }
  0x7b   :  { %423 = vmatmul.mubr.f32.vlgmr.msra.gmra.mrb[0].mxu0 %v67_v50  ;;  %2421 = vmatpush1.bf16.msra.mxu1 %v2420_v19  ;;  %v234_v50 = vld [vmem:[#allocation6 + $0x4e8] sm:$0xff]  ;;  %v252_v19 = vld [vmem:[#allocation6 + $0x578] sm:$0xff]  ;;  %v532_v35 = vrot.slane %v2085_v34, 6 }
  0x7c   :  { %2497 = vmatpush1.bf16.msra.mxu0 %v2496_v51  ;;  %428 = vmatprep.mubr.f32.mxu0 %v74_v57  ;;  %v236_v51 = vld [vmem:[#allocation6 + $0x4f8] sm:$0xff]  ;;  %v2929_v57 = vpack.c.bf16 %v517_v49, %v516_v48  ;;  %v69_v49 = vld [vmem:[#allocation3 + $0x20] sm:$0xff] }
  0x7d   :  { %2499 = vmatprep.subr.bf16.mxu0 %v2498_v53  ;;  %2423 = vmatprep.subr.bf16.mxu1 %v2422_v21  ;;  %v2848_v53 = vmov 0.0|0.0   ;;  %v2522_v58 = vpack.c.bf16 %v236_v51, %v234_v50  ;;  %v2538_v21 = vpack.c.bf16 %v252_v19, %v250_v18  ;;  %v76_v50 = vld [vmem:[#allocation3 + $0x58] sm:$0xff]  ;;  %v75_v51 = vld [vmem:[#allocation3 + $0x50] sm:$0xff] }
  0x7f   :  { %429 = vmatmul.mubr.f32.gmra.mrb[2].mxu0 %v73_v2  ;;  %2425 = vmatpush1.bf16.msra.mxu1 %v2424_v31  ;;  %v2526_v2 = vpack.c.bf16 %v240_v63, %v238_v62  ;;  %v260_v31 = vld [vmem:[#allocation6 + $0x5b8] sm:$0xff] }
  0x80   :  { %2501 = vmatpush1.bf16.msra.mxu0 %v2500_v0  ;;  %499 = vmatprep.mubr.f32.mxu0 %v70_v7  ;;  %v2524_v0 = vpack.c.bf16 %v235_v56, %v233_v55  ;;  %v244_v7 = vld [vmem:[#allocation6 + $0x538] sm:$0xff]  ;;  %v525_v55 = vld [vmem:[%s3193_s4] sm:$0x3] }
  0x81   :  { %2503 = vmatprep.subr.bf16.mxu0 %v2502_v3  ;;  %2427 = vmatprep.subr.bf16.mxu1 %v2426_v33  ;;  %v237_v3 = vld [vmem:[#allocation6 + $0x500] sm:$0xff]  ;;  %v2530_v9 = vpack.c.bf16 %v244_v7, %v242_v6  ;;  %v2546_v33 = vpack.c.bf16 %v260_v31, %v258_v30 }
  0x82   :  { %v2528_v8 = vpack.c.bf16 %v239_v4, %v237_v3  ;;  %v271_v3 = vlaneseq  ;;  %v269_v7 = vld [vmem:[%s3192_s3] sm:$0x3] }
  0x83   :  { %2429 = vmatpush1.bf16.msra.mxu1 %v2428_v40  ;;  %v261_v40 = vld [vmem:[#allocation6 + $0x5c0] sm:$0xff] }
  0x84   :  { %2505 = vmatpush1.bf16.msra.mxu0 %v2504_v14  ;;  %2582 = vmatprep.subr.bf16.mxu1 %v2848_v53  ;;  %v2532_v14 = vpack.c.bf16 %v243_v11, %v241_v10  ;;  %v2552_v44 = vpack.c.bf16 %v263_v41, %v261_v40  ;;  %v272_v4 = vshrl.u32 %v271_v3, 7 }
  0x85   :  { %2507 = vmatprep.subr.bf16.mxu0 %v2506_v15  ;;  %v2534_v15 = vpack.c.bf16 %v248_v13, %v246_v12 }
  0x86   :  { %346 = vmatmul.mubr.f32.vlgmr.msra.gmra.mrb[0].mxu1 %v65_v47  ;;  %v267_v47 = vld [vmem:[#allocation6 + $0x5f0] sm:$0xff]  ;;  %v273_v6 = vsub.s32 0, %v272_v4 }
  0x87   :  { %351 = vmatprep.mubr.f32.mxu1 %v72_v52  ;;  %2584 = vmatpush3.bf16.msra.mxu1 %v2929_v57  ;;  %v521_v52 = vld [vmem:[#allocation8 + $0x20] sm:$0xff] }
  0x88   :  { %2509 = vmatpush1.bf16.msra.mxu0 %v2508_v26  ;;  %2585 = vmatprep.subr.bf16.mxu1 %v2848_v53  ;;  %v2540_v26 = vpack.c.bf16 %v251_v23, %v249_v22 }
  0x89   :  { %2511 = vmatprep.subr.bf16.mxu0 %v2510_v27  ;;  %v2542_v27 = vpack.c.bf16 %v256_v25, %v254_v24 }
  0x8a   :  { %352 = vmatmul.mubr.f32.gmra.mrb[2].mxu1 %v71_v59  ;;  %v524_v59 = vld [vmem:[#allocation8 + $0x38] sm:$0xff] }
  0x8b   :  { %2242 = vmatprep.mubr.msk.f32.mxu1 %vm2849_vm0, %v2850_v5  ;;  %2587 = vmatpush3.bf16.msra.mxu1 %v2933_v1 }
  0x8c   :  { %2513 = vmatpush1.bf16.msra.mxu0 %v2512_v36  ;;  %2588 = vmatprep.subr.bf16.mxu1 %v2848_v53  ;;  %v262_v36 = vld [vmem:[#allocation6 + $0x5c8] sm:$0xff] }
  0x8d   :  { %2515 = vmatprep.subr.bf16.mxu0 %v2514_v37  ;;  %v264_v37 = vld [vmem:[#allocation6 + $0x5d8] sm:$0xff] }
  0x8e   :  { %v2550_v39 = vpack.c.bf16 %v264_v37, %v262_v36  ;;  %v528_v36 = vld [vmem:[%s3194_s5] sm:$0x3]  ;;  %s2853_s5 = smov [#allocation9]  }
  0x8f   :  { %s2071_s21 = sshll.u32 %s2853_s5, 4  ;;  %s2072_s21 = int_to_ptr.vmem [resolvable:$true] %s2071_s21 }
  0x90   :  { %2517 = vmatpush1.bf16.msra.mxu0 %v2516_v43  ;;  %v268_v43 = vld [vmem:[#allocation6 + $0x5f8] sm:$0xff]  ;;  %s2811_s22 = scalar_lea.vmem %s2072_s21, 256  ;;  %p2816_p11 = scmp.lt.s32.totalorder %s2072_s21, %s2072_s21 }
  0x91   :  { %2519 = vmatprep.subr.bf16.mxu0 %v2518_v46  ;;  %v2554_v45 = vpack.c.bf16 %v268_v43, %v266_v42  ;;  %v265_v46 = vld [vmem:[#allocation6 + $0x5e0] sm:$0xff]  ;;  %p2812_p10 = scmp.ne.s32.totalorder %s2072_s21, %s2811_s22  ;;  %p2817_p12 = scmp.lt.s32.totalorder %s2811_s22, %s2811_s22 }
  0x92   :  { %v2556_v48 = vpack.c.bf16 %v267_v47, %v265_v46 }
  0x93   :  { %p2818_p13 = por %p2817_p12, %p2816_p11 }
  0x94   :  { %2521 = vmatpush1.bf16.msra.mxu0 %v2520_v54  ;;  %v522_v54 = vld [vmem:[#allocation8 + $0x28] sm:$0xff] }
  0x95   :  { %2523 = vmatprep.subr.bf16.mxu0 %v2522_v58  ;;  %v2948_v56 = vpack.c.bf16 %v522_v54, %v521_v52  ;;  %v523_v58 = vld [vmem:[#allocation8 + $0x30] sm:$0xff]  ;;  %p2819_p0 = pnand %p2818_p13, %p2812_p10 }
  0x96   :  { %v2953_v60 = vpack.c.bf16 %v524_v59, %v523_v58 }
  0x98   :  { %2525 = vmatpush1.bf16.msra.mxu0 %v2524_v0 }
  0x99   :  { %2527 = vmatprep.subr.bf16.mxu0 %v2526_v2 }
  0x9c   :  { %2529 = vmatpush1.bf16.msra.mxu0 %v2528_v8  ;;  %v277_v8 = vsub.s32 1, %v272_v4 }
  0x9d   :  { %2531 = vmatprep.subr.bf16.mxu0 %v2530_v9  ;;  %v274_v9 = vrot.slane %v269_v7, %v273_v6 }
  0x9e   :  { %v278_v10 = vrot.slane %v269_v7, %v277_v8 }
  0xa0   :  { %2533 = vmatpush1.bf16.msra.mxu0 %v2532_v14 }
  0xa1   :  { %2535 = vmatprep.subr.bf16.mxu0 %v2534_v15 }
  0xa4   :  { %2537 = vmatpush1.bf16.msra.mxu0 %v2536_v20 }
  0xa5   :  { %2539 = vmatprep.subr.bf16.mxu0 %v2538_v21 }
  0xa8   :  { %2541 = vmatpush1.bf16.msra.mxu0 %v2540_v26 }
  0xa9   :  { %2543 = vmatprep.subr.bf16.mxu0 %v2542_v27 }
  0xac   :  { %2545 = vmatpush1.bf16.msra.mxu0 %v2544_v32 }
  0xad   :  { %2547 = vmatprep.subr.bf16.mxu0 %v2546_v33 }
  0xb0   :  { %2549 = vmatpush1.bf16.msra.mxu0 %v2548_v38  ;;  %v535_v38 = vsel %vm534_vm2, %v528_v36, %v532_v35 }
  0xb1   :  { %2551 = vmatprep.subr.bf16.mxu0 %v2550_v39 }
  0xb4   :  { %2553 = vmatpush1.bf16.msra.mxu0 %v2552_v44 }
  0xb5   :  { %2555 = vmatprep.subr.bf16.mxu0 %v2554_v45 }
  0xb8   :  { %2557 = vmatpush1.bf16.msra.mxu0 %v2556_v48 }
  0xb9   :  { %2558 = vmatprep.subr.bf16.mxu0 %v2848_v53 }
  0xbb   :  { %500 = vmatmul.mubr.f32.vlgmr.msra.gmra.mrb[0].mxu0 %v69_v49 }
  0xbc   :  { %2560 = vmatpush3.bf16.msra.mxu0 %v2929_v57  ;;  %505 = vmatprep.mubr.f32.mxu0 %v76_v50 }
  0xbd   :  { %2561 = vmatprep.subr.bf16.mxu0 %v2848_v53 }
  0xbf   :  { %506 = vmatmul.mubr.f32.gmra.mrb[2].mxu0 %v75_v51 }
  0xc0   :  { %2563 = vmatpush3.bf16.msra.mxu0 %v2933_v1  ;;  %2198 = vmatprep.mubr.msk.f32.mxu0 %vm2849_vm0, %v2850_v5 }
  0xc1   :  { %2564 = vmatprep.subr.bf16.mxu0 %v2848_v53 }
  0xc3   :  { %2199 = vmatmul.mubr.msk.f32.vlgmr.msra.gmra.mrb[4].mxu0 %vm537_vm1, %v525_v55 }
  0xc4   :  { %2566 = vmatpush3.bf16.msra.mxu0 %v2948_v56  ;;  %2209 = vmatprep.mubr.msk.f32.mxu0 %vm2849_vm0, %v2850_v5 }
  0xc5   :  { %2567 = vmatprep.subr.bf16.mxu0 %v2848_v53 }
  0xc8   :  { %2569 = vmatpush3.bf16.msra.mxu0 %v2953_v60 }
  0xc9   :  { %2570 = vmatprep.subr.bf16.mxu0 %v2848_v53 }
  0xcb   :  { %2210 = vmatmul.mubr.msk.f32.vlgmr.msra.gmra.mrb[6].mxu0 %vm537_vm1, %v2084_v61 }
  0xcc   :  { %2572 = vmatpush3.bf16.msra.mxu0 %v2929_v57  ;;  %2220 = vmatprep.mubr.msk.f32.mxu0 %vm2849_vm0, %v2850_v5 }
  0xcd   :  { %2573 = vmatprep.subr.bf16.mxu0 %v2848_v53 }
  0xd0   :  { %2575 = vmatpush3.bf16.msra.mxu0 %v2933_v1 }
  0xd1   :  { %2576 = vmatprep.subr.bf16.mxu0 %v2848_v53 }
 0x159   :  { %v347_v62 = vpop.f32.mrb[0].mxu1 }
 0x15a   :  { %v349_v63 = vpop.f32.mrb[1].mxu1  ;;  %v348_v11 = vadd.f32 %v347_v62, %v274_v9 }
 0x15b   :  { %v350_v12 = vadd.f32 %v349_v63, %v278_v10 }
 0x15d   :  { %v353_v0 = vpop.f32.mrb[2].mxu1 }
 0x15e   :  { %v355_v2 = vpop.f32.mrb[3].mxu1  ;;  %v354_v15 = vadd.f32 %v353_v0, %v274_v9 }
 0x15f   :  { %v356_v18 = vadd.f32 %v355_v2, %v278_v10 }
 0x18e   :  { %v501_v13 = vpop.f32.mrb[0].mxu0 }
 0x18f   :  { %v2655_v14 = vadd.f32 %v501_v13, %v348_v11  ;;  %v503_v16 = vpop.f32.mrb[1].mxu0 }
 0x190   :  { %v2657_v17 = vadd.f32 %v503_v16, %v350_v12 }
 0x191   :  { %512 = vst [vmem:[#allocation2] sm:$0xff] %v2655_v14 }
 0x192   :  { %513 = vst [vmem:[#allocation2 + $0x8] sm:$0xff] %v2657_v17  ;;  %v507_v19 = vpop.f32.mrb[2].mxu0 }
 0x193   :  { %v2659_v20 = vadd.f32 %v507_v19, %v354_v15  ;;  %v509_v21 = vpop.f32.mrb[3].mxu0 }
 0x194   :  { %v2661_v22 = vadd.f32 %v509_v21, %v356_v18 }
 0x195   :  { %514 = vst [vmem:[#allocation2 + $0x10] sm:$0xff] %v2659_v20 }
 0x196   :  { %515 = vst [vmem:[#allocation2 + $0x18] sm:$0xff] %v2661_v22  ;;  %v607_v23 = vpop.f32.mrb[4].mxu0 }
 0x197   :  { %v2200_v24 = vpop.f32.mrb[5].mxu0 }
 0x198   :  { %v536_v28 = vld [vmem:[#allocation2] sm:$0x3]  ;;  %v731_v62 = vld [vmem:[#allocation2] sm:$0xc] }
 0x199   :  { %v608_v31 = vadd.f32 %v607_v23, %v536_v28  ;;  %v733_v2 = vrot.slane %v731_v62, 2  ;;  %v923_v28 = vld [vmem:[#allocation2] sm:$0x30] }
 0x19d   :  { %v611_v25 = vld [vmem:[#allocation2 + $0x18] sm:$0xc0]  ;;  %v807_v61 = vld [vmem:[#allocation2 + $0x18] sm:$0x30] }
 0x19e   :  { %v613_v26 = vrot.slane %v611_v25, 6  ;;  %v684_v27 = vpop.f32.mrb[6].mxu0  ;;  %v812_v63 = vrot.slane %v807_v61, 4  ;;  %v1191_v61 = vld [vmem:[#allocation2 + $0x18] sm:$0x3] }
 0x19f   :  { %v2211_v29 = vpop.f32.mrb[7].mxu0 }
 0x1a0   :  { %v685_v30 = vadd.f32 %v684_v27, %v613_v26  ;;  %v999_v27 = vld [vmem:[#allocation2 + $0x18] sm:$0xc] }
 0x1a1   :  { %v1004_v29 = vrot.slane %v999_v27, 2 }
 0x1a2   :  { %v689_v32 = vrot.slane %v685_v30, 6 }
 0x1a4   :  { %v691_v33 = vsel %vm534_vm2, %v608_v31, %v689_v32  ;;  %v925_v31 = vrot.slane %v923_v28, 4 }
 0x1a5   :  { %2681 = vtanh.f32 %v691_v33  ;;  %v2088_v39 = vmul.f32 -1.442695, %v691_v33 }
 0x1a7   :  { %2683 = vpow2.f32 %v2088_v39 }
 0x1af   :  { %v2682_v37 = vpop.eup %2681 }
 0x1b0   :  { %705 = vrot.lane.b32.xlu0 %v2682_v37, %s2851_s20 }
 0x1b1   :  { %v2684_v40 = vpop.eup %2683 }
 0x1b2   :  { %v695_v41 = vadd.f32 1.0, %v2684_v40 }
 0x1b4   :  { %700 = vrot.lane.b32.xlu0 %v535_v38, %s2852_s1  ;;  %2685 = vrcp.f32 %v695_v41 }
 0x1be   :  { %v2686_v42 = vpop.eup %2685 }
 0x222   :  { %v706_v43 = vpop.permute.xlu0 %705 }
 0x223   :  { %v708_v44 = vmul.f32 %v2686_v42, %v706_v43 }
 0x225   :  { %710 = vrot.lane.b32.xlu1 %v708_v44, %s2852_s1 }
 0x226   :  { %v701_v45 = vpop.permute.xlu0 %700 }
 0x227   :  { %v703_v46 = vmul.f32 %v2686_v42, %v701_v45 }
 0x297   :  { %v711_v47 = vpop.permute.xlu1 %710 }
 0x298   :  { %v713_v48 = vadd.f32 %v711_v47, %v703_v46 }
 0x29a   :  { %2687 = vtanh.f32 %v713_v48 }
 0x2a4   :  { %v2688_v49 = vpop.eup %2687 }
 0x2a5   :  { %716 = vrot.lane.b32.xlu1 %v2688_v49, %s2851_s20 }
 0x317   :  { %v717_v50 = vpop.permute.xlu1 %716 }
 0x318   :  { %v2985_v51 = vmul.f32 %v2686_v42, %v717_v50 }
 0x31a   :  { %721 = vrot.lane.b32.xlu0 %v2985_v51, %s2852_s1  ;;  %v808_v52 = vrot.slane %v2985_v51, 2 }
 0x31c   :  { %809 = vrot.lane.b32.xlu1 %v808_v52, %s2852_s1 }
 0x38c   :  { %v722_v54 = vpop.permute.xlu0 %721 }
 0x38d   :  { %725 = vst.msk [vmem:[#allocation9] sm:$0x3] %vm724_vm3, %v722_v54  ;;  %2221 = vmatmul.mubr.msk.f32.vlgmr.msra.gmra.mrb[8].mxu0 %vm537_vm1, %v722_v54 }
 0x38e   :  { %2578 = vmatpush3.bf16.msra.mxu0 %v2948_v56  ;;  %2231 = vmatprep.mubr.msk.f32.mxu0 %vm2849_vm0, %v2850_v5  ;;  %v810_v55 = vpop.permute.xlu1 %809 }
 0x38f   :  { %2579 = vmatprep.subr.bf16.mxu0 %v2848_v53 }
 0x392   :  { %2581 = vmatpush3.bf16.msra.mxu0 %v2953_v60 }
 0x395   :  { %2232 = vmatmul.mubr.msk.f32.vlgmr.msra.gmra.mrb[10].mxu0 %vm537_vm1, %v810_v55 }
 0x460   :  { %v803_v58 = vpop.f32.mrb[8].mxu0 }
 0x461   :  { %v2222_v59 = vpop.f32.mrb[9].mxu0  ;;  %v804_v6 = vadd.f32 %v803_v58, %v733_v2 }
 0x462   :  { %v1115_v59 = vld [vmem:[#allocation2] sm:$0xc0] }
 0x468   :  { %v882_v0 = vpop.f32.mrb[10].mxu0 }
 0x469   :  { %v883_v3 = vadd.f32 %v882_v0, %v812_v63  ;;  %v2233_v4 = vpop.f32.mrb[11].mxu0  ;;  %v1117_v63 = vrot.slane %v1115_v59, 6  ;;  %v1493_v59 = vld [vmem:[#allocation2 + $0x10] sm:$0xc] }
 0x46b   :  { %v887_v7 = vrot.slane %v883_v3, 6 }
 0x46d   :  { %v889_v8 = vsel %vm534_vm2, %v804_v6, %v887_v7 }
 0x46e   :  { %2689 = vtanh.f32 %v889_v8  ;;  %v2091_v10 = vmul.f32 -1.442695, %v889_v8 }
 0x470   :  { %2691 = vpow2.f32 %v2091_v10 }
 0x478   :  { %v2690_v9 = vpop.eup %2689 }
 0x479   :  { %899 = vrot.lane.b32.xlu0 %v2690_v9, %s2851_s20 }
 0x47a   :  { %v2692_v11 = vpop.eup %2691 }
 0x47b   :  { %v893_v12 = vadd.f32 1.0, %v2692_v11 }
 0x47d   :  { %2693 = vrcp.f32 %v893_v12 }
 0x487   :  { %v2694_v13 = vpop.eup %2693 }
 0x488   :  { %v897_v16 = vmul.f32 %v2694_v13, %v713_v48 }
 0x4eb   :  { %v900_v14 = vpop.permute.xlu0 %899 }
 0x4ec   :  { %v902_v15 = vmul.f32 %v2694_v13, %v900_v14 }
 0x4ee   :  { %904 = vrot.lane.b32.xlu1 %v902_v15, %s2852_s1 }
 0x560   :  { %v905_v17 = vpop.permute.xlu1 %904 }
 0x561   :  { %v907_v18 = vadd.f32 %v905_v17, %v897_v16 }
 0x563   :  { %2695 = vtanh.f32 %v907_v18 }
 0x56d   :  { %v2696_v19 = vpop.eup %2695 }
 0x56e   :  { %910 = vrot.lane.b32.xlu0 %v2696_v19, %s2851_s20 }
 0x5e0   :  { %v911_v20 = vpop.permute.xlu0 %910 }
 0x5e1   :  { %v3003_v21 = vmul.f32 %v2694_v13, %v911_v20 }
 0x5e3   :  { %915 = vrot.lane.b32.xlu1 %v3003_v21, %s2852_s1  ;;  %v1000_v22 = vrot.slane %v3003_v21, 2 }
 0x5e5   :  { %1001 = vrot.lane.b32.xlu0 %v1000_v22, %s2852_s1 }
 0x655   :  { %v916_v23 = vpop.permute.xlu1 %915 }
 0x656   :  { %918 = vst.msk [vmem:[#allocation9 + $0x2] sm:$0x3] %vm724_vm3, %v916_v23  ;;  %2243 = vmatmul.mubr.msk.f32.vlgmr.msra.gmra.mrb[4].mxu1 %vm537_vm1, %v916_v23 }
 0x657   :  { %2590 = vmatpush3.bf16.msra.mxu1 %v2948_v56  ;;  %2253 = vmatprep.mubr.msk.f32.mxu1 %vm2849_vm0, %v2850_v5  ;;  %v1002_v24 = vpop.permute.xlu0 %1001 }
 0x658   :  { %2591 = vmatprep.subr.bf16.mxu1 %v2848_v53 }
 0x65b   :  { %2593 = vmatpush3.bf16.msra.mxu1 %v2953_v60 }
 0x65c   :  { %2594 = vmatprep.subr.bf16.mxu1 %v2848_v53 }
 0x65e   :  { %2254 = vmatmul.mubr.msk.f32.vlgmr.msra.gmra.mrb[6].mxu1 %vm537_vm1, %v1002_v24 }
 0x65f   :  { %2596 = vmatpush3.bf16.msra.mxu1 %v2929_v57  ;;  %2264 = vmatprep.mubr.msk.f32.mxu1 %vm2849_vm0, %v2850_v5 }
 0x660   :  { %2597 = vmatprep.subr.bf16.mxu1 %v2848_v53 }
 0x663   :  { %2599 = vmatpush3.bf16.msra.mxu1 %v2933_v1 }
 0x664   :  { %2600 = vmatprep.subr.bf16.mxu1 %v2848_v53 }
 0x729   :  { %v995_v25 = vpop.f32.mrb[4].mxu1 }
 0x72a   :  { %v2244_v26 = vpop.f32.mrb[5].mxu1  ;;  %v996_v34 = vadd.f32 %v995_v25, %v925_v31  ;;  %v1304_v31 = vld [vmem:[#allocation2 + $0x10] sm:$0x3] }
 0x72b   :  { %v1377_v26 = vld [vmem:[#allocation2 + $0x8] sm:$0xc0] }
 0x72c   :  { %v1382_v27 = vrot.slane %v1377_v26, 6 }
 0x731   :  { %v1074_v30 = vpop.f32.mrb[6].mxu1 }
 0x732   :  { %v1075_v32 = vadd.f32 %v1074_v30, %v1004_v29  ;;  %v2255_v33 = vpop.f32.mrb[7].mxu1 }
 0x734   :  { %v1079_v35 = vrot.slane %v1075_v32, 6 }
 0x736   :  { %v1081_v36 = vsel %vm534_vm2, %v996_v34, %v1079_v35 }
 0x737   :  { %2697 = vtanh.f32 %v1081_v36  ;;  %v2094_v38 = vmul.f32 -1.442695, %v1081_v36 }
 0x739   :  { %2699 = vpow2.f32 %v2094_v38 }
 0x741   :  { %v2698_v37 = vpop.eup %2697 }
 0x742   :  { %1091 = vrot.lane.b32.xlu1 %v2698_v37, %s2851_s20 }
 0x743   :  { %v2700_v39 = vpop.eup %2699 }
 0x744   :  { %v1085_v40 = vadd.f32 1.0, %v2700_v39 }
 0x746   :  { %2701 = vrcp.f32 %v1085_v40 }
 0x750   :  { %v2702_v41 = vpop.eup %2701 }
 0x751   :  { %v1089_v44 = vmul.f32 %v2702_v41, %v907_v18 }
 0x7b4   :  { %v1092_v42 = vpop.permute.xlu1 %1091 }
 0x7b5   :  { %v1094_v43 = vmul.f32 %v2702_v41, %v1092_v42 }
 0x7b7   :  { %1096 = vrot.lane.b32.xlu0 %v1094_v43, %s2852_s1 }
 0x829   :  { %v1097_v45 = vpop.permute.xlu0 %1096 }
 0x82a   :  { %v1099_v46 = vadd.f32 %v1097_v45, %v1089_v44 }
 0x82c   :  { %2703 = vtanh.f32 %v1099_v46 }
 0x836   :  { %v2704_v47 = vpop.eup %2703 }
 0x837   :  { %1102 = vrot.lane.b32.xlu1 %v2704_v47, %s2851_s20 }
 0x8a9   :  { %v1103_v48 = vpop.permute.xlu1 %1102 }
 0x8aa   :  { %v3028_v49 = vmul.f32 %v2702_v41, %v1103_v48 }
 0x8ac   :  { %1107 = vrot.lane.b32.xlu0 %v3028_v49, %s2852_s1  ;;  %v1192_v50 = vrot.slane %v3028_v49, 2 }
 0x8ae   :  { %1193 = vrot.lane.b32.xlu1 %v1192_v50, %s2852_s1 }
 0x91e   :  { %v1108_v52 = vpop.permute.xlu0 %1107 }
 0x91f   :  { %1110 = vst.msk [vmem:[#allocation9 + $0x4] sm:$0x3] %vm724_vm3, %v1108_v52  ;;  %2265 = vmatmul.mubr.msk.f32.vlgmr.msra.gmra.mrb[8].mxu1 %vm537_vm1, %v1108_v52 }
 0x920   :  { %2602 = vmatpush3.bf16.msra.mxu1 %v2948_v56  ;;  %2275 = vmatprep.mubr.msk.f32.mxu1 %vm2849_vm0, %v2850_v5  ;;  %v1194_v54 = vpop.permute.xlu1 %1193 }
 0x921   :  { %2603 = vmatprep.subr.bf16.mxu1 %v2848_v53 }
 0x924   :  { %2605 = vmatpush3.bf16.msra.mxu1 %v2953_v60 }
 0x925   :  { %2606 = vmatprep.subr.bf16.mxu1 %v2848_v53 }
 0x927   :  { %2276 = vmatmul.mubr.msk.f32.vlgmr.msra.gmra.mrb[10].mxu1 %vm537_vm1, %v1194_v54 }
 0x928   :  { %2608 = vmatpush3.bf16.msra.mxu1 %v2929_v57  ;;  %2286 = vmatprep.mubr.msk.f32.mxu1 %vm2849_vm0, %v2850_v5 }
 0x929   :  { %2609 = vmatprep.subr.bf16.mxu1 %v2848_v53 }
 0x92c   :  { %2611 = vmatpush3.bf16.msra.mxu1 %v2933_v1 }
 0x92d   :  { %2612 = vmatprep.subr.bf16.mxu1 %v2848_v53 }
 0x9f2   :  { %v1187_v55 = vpop.f32.mrb[8].mxu1 }
 0x9f3   :  { %v2266_v58 = vpop.f32.mrb[9].mxu1  ;;  %v1188_v3 = vadd.f32 %v1187_v55, %v1117_v63  ;;  %v1495_v63 = vrot.slane %v1493_v59, 2 }
 0x9f4   :  { %v1569_v58 = vld [vmem:[#allocation2 + $0x8] sm:$0x30] }
 0x9fa   :  { %v1263_v62 = vpop.f32.mrb[10].mxu1 }
 0x9fb   :  { %v1264_v0 = vadd.f32 %v1263_v62, %v1191_v61  ;;  %v2277_v2 = vpop.f32.mrb[11].mxu1  ;;  %v1574_v61 = vrot.slane %v1569_v58, 4 }
 0x9fd   :  { %v1268_v4 = vrot.slane %v1264_v0, 6 }
 0x9ff   :  { %v1270_v6 = vsel %vm534_vm2, %v1188_v3, %v1268_v4 }
 0xa00   :  { %2705 = vtanh.f32 %v1270_v6  ;;  %v2097_v8 = vmul.f32 -1.442695, %v1270_v6 }
 0xa02   :  { %2707 = vpow2.f32 %v2097_v8 }
 0xa0a   :  { %v2706_v7 = vpop.eup %2705 }
 0xa0b   :  { %1280 = vrot.lane.b32.xlu0 %v2706_v7, %s2851_s20 }
 0xa0c   :  { %v2708_v9 = vpop.eup %2707 }
 0xa0d   :  { %v1274_v10 = vadd.f32 1.0, %v2708_v9 }
 0xa0f   :  { %2709 = vrcp.f32 %v1274_v10 }
 0xa19   :  { %v2710_v11 = vpop.eup %2709 }
 0xa1a   :  { %v1278_v14 = vmul.f32 %v2710_v11, %v1099_v46 }
 0xa7d   :  { %v1281_v12 = vpop.permute.xlu0 %1280 }
 0xa7e   :  { %v1283_v13 = vmul.f32 %v2710_v11, %v1281_v12 }
 0xa80   :  { %1285 = vrot.lane.b32.xlu1 %v1283_v13, %s2852_s1 }
 0xaf2   :  { %v1286_v15 = vpop.permute.xlu1 %1285 }
 0xaf3   :  { %v1288_v16 = vadd.f32 %v1286_v15, %v1278_v14 }
 0xaf5   :  { %2711 = vtanh.f32 %v1288_v16 }
 0xaff   :  { %v2712_v17 = vpop.eup %2711 }
 0xb00   :  { %1291 = vrot.lane.b32.xlu0 %v2712_v17, %s2851_s20 }
 0xb72   :  { %v1292_v18 = vpop.permute.xlu0 %1291 }
 0xb73   :  { %v3053_v19 = vmul.f32 %v2710_v11, %v1292_v18 }
 0xb75   :  { %1296 = vrot.lane.b32.xlu1 %v3053_v19, %s2852_s1  ;;  %v1378_v20 = vrot.slane %v3053_v19, 2 }
 0xb77   :  { %1379 = vrot.lane.b32.xlu0 %v1378_v20, %s2852_s1 }
 0xbe7   :  { %v1297_v22 = vpop.permute.xlu1 %1296 }
 0xbe8   :  { %1299 = vst.msk [vmem:[#allocation9 + $0x6] sm:$0x3] %vm724_vm3, %v1297_v22  ;;  %2287 = vmatmul.mubr.msk.f32.vlgmr.msra.gmra.mrb[12].mxu1 %vm537_vm1, %v1297_v22 }
 0xbe9   :  { %2614 = vmatpush3.bf16.msra.mxu1 %v2948_v56  ;;  %2297 = vmatprep.mubr.msk.f32.mxu1 %vm2849_vm0, %v2850_v5  ;;  %v1380_v23 = vpop.permute.xlu0 %1379 }
 0xbea   :  { %2615 = vmatprep.subr.bf16.mxu1 %v2848_v53 }
 0xbed   :  { %2617 = vmatpush3.bf16.msra.mxu1 %v2953_v60 }
 0xbee   :  { %2618 = vmatprep.subr.bf16.mxu1 %v2848_v53 }
 0xbf0   :  { %2298 = vmatmul.mubr.msk.f32.vlgmr.msra.gmra.mrb[14].mxu1 %vm537_vm1, %v1380_v23 }
 0xbf1   :  { %2620 = vmatpush3.bf16.msra.mxu1 %v2929_v57  ;;  %2308 = vmatprep.mubr.msk.f32.mxu1 %vm2849_vm0, %v2850_v5 }
 0xbf2   :  { %2621 = vmatprep.subr.bf16.mxu1 %v2848_v53 }
 0xbf5   :  { %2623 = vmatpush3.bf16.msra.mxu1 %v2933_v1 }
 0xbf6   :  { %2624 = vmatprep.subr.bf16.mxu1 %v2848_v53 }
 0xcbb   :  { %v1373_v24 = vpop.f32.mrb[12].mxu1 }
 0xcbc   :  { %v2288_v25 = vpop.f32.mrb[13].mxu1  ;;  %v1374_v32 = vadd.f32 %v1373_v24, %v1304_v31 }
 0xcc3   :  { %v1452_v28 = vpop.f32.mrb[14].mxu1 }
 0xcc4   :  { %v1453_v29 = vadd.f32 %v1452_v28, %v1382_v27  ;;  %v2299_v30 = vpop.f32.mrb[15].mxu1  ;;  %v1761_v27 = vld [vmem:[#allocation2 + $0x8] sm:$0xc]  ;;  %v1685_v28 = vld [vmem:[#allocation2 + $0x10] sm:$0x30] }
 0xcc5   :  { %v1687_v31 = vrot.slane %v1685_v28, 4 }
 0xcc6   :  { %v1457_v33 = vrot.slane %v1453_v29, 6  ;;  %v1766_v29 = vrot.slane %v1761_v27, 2 }
 0xcc8   :  { %v1459_v34 = vsel %vm534_vm2, %v1374_v32, %v1457_v33 }
 0xcc9   :  { %2713 = vtanh.f32 %v1459_v34  ;;  %v2100_v36 = vmul.f32 -1.442695, %v1459_v34 }
 0xccb   :  { %2715 = vpow2.f32 %v2100_v36 }
 0xcd3   :  { %v2714_v35 = vpop.eup %2713 }
 0xcd4   :  { %1469 = vrot.lane.b32.xlu1 %v2714_v35, %s2851_s20 }
 0xcd5   :  { %v2716_v37 = vpop.eup %2715 }
 0xcd6   :  { %v1463_v38 = vadd.f32 1.0, %v2716_v37 }
 0xcd8   :  { %2717 = vrcp.f32 %v1463_v38 }
 0xce2   :  { %v2718_v39 = vpop.eup %2717 }
 0xce3   :  { %v1467_v42 = vmul.f32 %v2718_v39, %v1288_v16 }
 0xd46   :  { %v1470_v40 = vpop.permute.xlu1 %1469 }
 0xd47   :  { %v1472_v41 = vmul.f32 %v2718_v39, %v1470_v40 }
 0xd49   :  { %1474 = vrot.lane.b32.xlu0 %v1472_v41, %s2852_s1 }
 0xdbb   :  { %v1475_v43 = vpop.permute.xlu0 %1474 }
 0xdbc   :  { %v1477_v44 = vadd.f32 %v1475_v43, %v1467_v42 }
 0xdbe   :  { %2719 = vtanh.f32 %v1477_v44 }
 0xdc8   :  { %v2720_v45 = vpop.eup %2719 }
 0xdc9   :  { %1480 = vrot.lane.b32.xlu1 %v2720_v45, %s2851_s20 }
 0xe3b   :  { %v1481_v46 = vpop.permute.xlu1 %1480 }
 0xe3c   :  { %v3078_v47 = vmul.f32 %v2718_v39, %v1481_v46 }
 0xe3e   :  { %1485 = vrot.lane.b32.xlu0 %v3078_v47, %s2852_s1  ;;  %v1570_v48 = vrot.slane %v3078_v47, 2 }
 0xe40   :  { %1571 = vrot.lane.b32.xlu1 %v1570_v48, %s2852_s1 }
 0xeb0   :  { %v3084_v50 = vpop.permute.xlu0 %1485 }
 0xeb1   :  { %2309 = vmatmul.mubr.msk.f32.vlgmr.msra.gmra.mrb[16].mxu1 %vm537_vm1, %v3084_v50 }
 0xeb2   :  { %2626 = vmatpush3.bf16.msra.mxu1 %v2948_v56  ;;  %2319 = vmatprep.mubr.msk.f32.mxu1 %vm2849_vm0, %v2850_v5  ;;  %v1572_v52 = vpop.permute.xlu1 %1571 }
 0xeb3   :  { %2627 = vmatprep.subr.bf16.mxu1 %v2848_v53 }
 0xeb6   :  { %2629 = vmatpush3.bf16.msra.mxu1 %v2953_v60 }
 0xeb7   :  { %2630 = vmatprep.subr.bf16.mxu1 %v2848_v53 }
 0xeb9   :  { %2320 = vmatmul.mubr.msk.f32.vlgmr.msra.gmra.mrb[18].mxu1 %vm537_vm1, %v1572_v52 }
 0xeba   :  { %2632 = vmatpush3.bf16.msra.mxu1 %v2929_v57  ;;  %2330 = vmatprep.mubr.msk.f32.mxu1 %vm2849_vm0, %v2850_v5 }
 0xebb   :  { %2633 = vmatprep.subr.bf16.mxu1 %v2848_v53 }
 0xebe   :  { %2635 = vmatpush3.bf16.msra.mxu1 %v2933_v1 }
 0xebf   :  { %2636 = vmatprep.subr.bf16.mxu1 %v2848_v53 }
 0xf84   :  { %v1565_v54 = vpop.f32.mrb[16].mxu1 }
 0xf85   :  { %v2310_v55 = vpop.f32.mrb[17].mxu1  ;;  %v1566_v3 = vadd.f32 %v1565_v54, %v1495_v63 }
 0xf8c   :  { %v1644_v62 = vpop.f32.mrb[18].mxu1 }
 0xf8d   :  { %v1645_v0 = vadd.f32 %v1644_v62, %v1574_v61  ;;  %v2321_v2 = vpop.f32.mrb[19].mxu1  ;;  %v1877_v61 = vld [vmem:[#allocation2 + $0x10] sm:$0xc0]  ;;  %v1953_v62 = vld [vmem:[#allocation2 + $0x8] sm:$0x3] }
 0xf8f   :  { %v1649_v4 = vrot.slane %v1645_v0, 6  ;;  %v1879_v0 = vrot.slane %v1877_v61, 6 }
 0xf91   :  { %v1651_v6 = vsel %vm534_vm2, %v1566_v3, %v1649_v4 }
 0xf92   :  { %2721 = vtanh.f32 %v1651_v6  ;;  %v2103_v8 = vmul.f32 -1.442695, %v1651_v6 }
 0xf94   :  { %2723 = vpow2.f32 %v2103_v8 }
 0xf9c   :  { %v2722_v7 = vpop.eup %2721 }
 0xf9d   :  { %1661 = vrot.lane.b32.xlu0 %v2722_v7, %s2851_s20 }
 0xf9e   :  { %v2724_v9 = vpop.eup %2723 }
 0xf9f   :  { %v1655_v10 = vadd.f32 1.0, %v2724_v9 }
 0xfa1   :  { %2725 = vrcp.f32 %v1655_v10 }
 0xfab   :  { %v2726_v11 = vpop.eup %2725 }
 0xfac   :  { %v1659_v14 = vmul.f32 %v2726_v11, %v1477_v44 }
0x100f   :  { %v1662_v12 = vpop.permute.xlu0 %1661 }
0x1010   :  { %v1664_v13 = vmul.f32 %v2726_v11, %v1662_v12 }
0x1012   :  { %1666 = vrot.lane.b32.xlu1 %v1664_v13, %s2852_s1 }
0x1084   :  { %v1667_v15 = vpop.permute.xlu1 %1666 }
0x1085   :  { %v1669_v16 = vadd.f32 %v1667_v15, %v1659_v14 }
0x1087   :  { %2727 = vtanh.f32 %v1669_v16 }
0x1091   :  { %v2728_v17 = vpop.eup %2727 }
0x1092   :  { %1672 = vrot.lane.b32.xlu0 %v2728_v17, %s2851_s20 }
0x1104   :  { %v1673_v18 = vpop.permute.xlu0 %1672 }
0x1105   :  { %v3105_v20 = vmul.f32 %v2726_v11, %v1673_v18 }
0x1107   :  { %1677 = vrot.lane.b32.xlu1 %v3105_v20, %s2852_s1  ;;  %v1762_v22 = vrot.slane %v3105_v20, 2 }
0x1109   :  { %1763 = vrot.lane.b32.xlu0 %v1762_v22, %s2852_s1 }
0x1179   :  { %v3111_v23 = vpop.permute.xlu1 %1677 }
0x117a   :  { %2331 = vmatmul.mubr.msk.f32.vlgmr.msra.gmra.mrb[20].mxu1 %vm537_vm1, %v3111_v23 }
0x117b   :  { %2638 = vmatpush3.bf16.msra.mxu1 %v2948_v56  ;;  %2341 = vmatprep.mubr.msk.f32.mxu1 %vm2849_vm0, %v2850_v5  ;;  %v1764_v24 = vpop.permute.xlu0 %1763 }
0x117c   :  { %2639 = vmatprep.subr.bf16.mxu1 %v2848_v53 }
0x117f   :  { %2641 = vmatpush3.bf16.msra.mxu1 %v2953_v60 }
0x1180   :  { %2642 = vmatprep.subr.bf16.mxu1 %v2848_v53 }
0x1182   :  { %2342 = vmatmul.mubr.msk.f32.vlgmr.msra.gmra.mrb[22].mxu1 %vm537_vm1, %v1764_v24 }
0x1183   :  { %2644 = vmatpush3.bf16.msra.mxu1 %v2929_v57  ;;  %2352 = vmatprep.mubr.msk.f32.mxu1 %vm2849_vm0, %v2850_v5 }
0x1184   :  { %2645 = vmatprep.subr.bf16.mxu1 %v2848_v53 }
0x1187   :  { %2647 = vmatpush3.bf16.msra.mxu1 %v2933_v1 }
0x1188   :  { %2648 = vmatprep.subr.bf16.mxu1 %v2848_v53 }
0x124d   :  { %v1757_v25 = vpop.f32.mrb[20].mxu1 }
0x124e   :  { %v2332_v26 = vpop.f32.mrb[21].mxu1  ;;  %v1758_v34 = vadd.f32 %v1757_v25, %v1687_v31 }
0x1255   :  { %v1836_v30 = vpop.f32.mrb[22].mxu1 }
0x1256   :  { %v1837_v32 = vadd.f32 %v1836_v30, %v1766_v29  ;;  %v2343_v33 = vpop.f32.mrb[23].mxu1 }
0x1258   :  { %v1841_v57 = vrot.slane %v1837_v32, 6 }
0x125a   :  { %v1843_v35 = vsel %vm534_vm2, %v1758_v34, %v1841_v57 }
0x125b   :  { %2729 = vtanh.f32 %v1843_v35  ;;  %v2106_v1 = vmul.f32 -1.442695, %v1843_v35 }
0x125d   :  { %2731 = vpow2.f32 %v2106_v1 }
0x1265   :  { %v2730_v36 = vpop.eup %2729 }
0x1266   :  { %1853 = vrot.lane.b32.xlu1 %v2730_v36, %s2851_s20 }
0x1267   :  { %v2732_v37 = vpop.eup %2731 }
0x1268   :  { %v1847_v38 = vadd.f32 1.0, %v2732_v37 }
0x126a   :  { %2733 = vrcp.f32 %v1847_v38 }
0x1274   :  { %v2734_v39 = vpop.eup %2733 }
0x1275   :  { %v1851_v42 = vmul.f32 %v2734_v39, %v1669_v16 }
0x12d8   :  { %v1854_v40 = vpop.permute.xlu1 %1853 }
0x12d9   :  { %v1856_v41 = vmul.f32 %v2734_v39, %v1854_v40 }
0x12db   :  { %1858 = vrot.lane.b32.xlu0 %v1856_v41, %s2852_s1 }
0x134d   :  { %v1859_v43 = vpop.permute.xlu0 %1858 }
0x134e   :  { %v1861_v44 = vadd.f32 %v1859_v43, %v1851_v42 }
0x1350   :  { %2735 = vtanh.f32 %v1861_v44 }
0x135a   :  { %v2736_v45 = vpop.eup %2735 }
0x135b   :  { %1864 = vrot.lane.b32.xlu1 %v2736_v45, %s2851_s20 }
0x13cd   :  { %v1865_v46 = vpop.permute.xlu1 %1864 }
0x13ce   :  { %v1867_v48 = vmul.f32 %v2734_v39, %v1865_v46 }
0x13d0   :  { %1869 = vrot.lane.b32.xlu0 %v1867_v48, %s2852_s1  ;;  %v1954_v52 = vrot.slane %v1867_v48, 2 }
0x13d2   :  { %1955 = vrot.lane.b32.xlu1 %v1954_v52, %s2852_s1 }
0x1442   :  { %v1870_v54 = vpop.permute.xlu0 %1869 }
0x1443   :  { %2353 = vmatmul.mubr.msk.f32.vlgmr.msra.gmra.mrb[24].mxu1 %vm537_vm1, %v1870_v54 }
0x1444   :  { %2650 = vmatpush3.bf16.msra.mxu1 %v2948_v56  ;;  %2363 = vmatprep.mubr.msk.f32.mxu1 %vm2849_vm0, %v2850_v5  ;;  %v1956_v55 = vpop.permute.xlu1 %1955 }
0x1445   :  { %2651 = vmatprep.subr.bf16.mxu1 %v2848_v53 }
0x1448   :  { %2653 = vmatpush3.bf16.msra.mxu1 %v2953_v60 }
0x144b   :  { %2364 = vmatmul.mubr.msk.f32.vlgmr.msra.gmra.mrb[26].mxu1 %vm537_vm1, %v1956_v55 }
0x1516   :  { %v1949_v58 = vpop.f32.mrb[24].mxu1 }
0x1517   :  { %v2354_v59 = vpop.f32.mrb[25].mxu1  ;;  %v1950_v4 = vadd.f32 %v1949_v58, %v1879_v0 }
0x151e   :  { %v2025_v63 = vpop.f32.mrb[26].mxu1 }
0x151f   :  { %v2026_v2 = vadd.f32 %v2025_v63, %v1953_v62  ;;  %v2365_v3 = vpop.f32.mrb[27].mxu1 }
0x1521   :  { %v2030_v56 = vrot.slane %v2026_v2, 6 }
0x1523   :  { %v2032_v6 = vsel %vm534_vm2, %v1950_v4, %v2030_v56 }
0x1524   :  { %2737 = vtanh.f32 %v2032_v6  ;;  %v2109_v53 = vmul.f32 -1.442695, %v2032_v6 }
0x1526   :  { %2739 = vpow2.f32 %v2109_v53 }
0x152e   :  { %v2738_v5 = vpop.eup %2737 }
0x152f   :  { %2042 = vrot.lane.b32.xlu0 %v2738_v5, %s2851_s20 }
0x1530   :  { %v2740_v60 = vpop.eup %2739 }
0x1531   :  { %v2036_v7 = vadd.f32 1.0, %v2740_v60 }
0x1533   :  { %2741 = vrcp.f32 %v2036_v7 }
0x153d   :  { %v2742_v8 = vpop.eup %2741 }
0x153e   :  { %v2040_v11 = vmul.f32 %v2742_v8, %v1861_v44 }
0x15a1   :  { %v2043_v9 = vpop.permute.xlu0 %2042 }
0x15a2   :  { %v2045_v10 = vmul.f32 %v2742_v8, %v2043_v9 }
0x15a4   :  { %2047 = vrot.lane.b32.xlu1 %v2045_v10, %s2852_s1 }
0x15a8   :  { %726 = vrot.lane.b32.xlu1 %v2985_v51, %s2851_s20 }
0x15ac   :  { %1111 = vrot.lane.b32.xlu1 %v3028_v49, %s2851_s20 }
0x15b0   :  { %1489 = vrot.lane.b32.xlu1 %v3078_v47, %s2851_s20 }
0x15b4   :  { %1873 = vrot.lane.b32.xlu1 %v1867_v48, %s2851_s20 }
0x1616   :  { %v2048_v12 = vpop.permute.xlu1 %2047 }
0x1617   :  { %v2050_v13 = vadd.f32 %v2048_v12, %v2040_v11 }
0x1619   :  { %2743 = vtanh.f32 %v2050_v13 }
0x161a   :  { %v727_v14 = vpop.permute.xlu1 %726 }
0x161b   :  { %730 = vst.msk [vmem:[#allocation9 + $0xc] sm:$0xc] %vm729_vm4, %v727_v14 }
0x161e   :  { %v1112_v15 = vpop.permute.xlu1 %1111 }
0x161f   :  { %1114 = vst.msk [vmem:[#allocation9 + $0x8] sm:$0xc] %vm729_vm4, %v1112_v15 }
0x1620   :  { %1680 = vst.msk [vmem:[#allocation9 + $0xa] sm:$0x3] %vm724_vm3, %v3111_v23 }
0x1622   :  { %v1490_v51 = vpop.permute.xlu1 %1489 }
0x1623   :  { %v2744_v49 = vpop.eup %2743  ;;  %1492 = vst.msk [vmem:[#allocation9 + $0x4] sm:$0xc] %vm729_vm4, %v1490_v51 }
0x1624   :  { %2053 = vrot.lane.b32.xlu0 %v2744_v49, %s2851_s20 }
0x1626   :  { %v1874_v47 = vpop.permute.xlu1 %1873 }
0x1627   :  { %1876 = vst.msk [vmem:[#allocation9] sm:$0xc] %vm729_vm4, %v1874_v47 }
0x1628   :  { %919 = vrot.lane.b32.xlu0 %v3003_v21, %s2851_s20 }
0x162c   :  { %1300 = vrot.lane.b32.xlu0 %v3053_v19, %s2851_s20 }
0x1630   :  { %1681 = vrot.lane.b32.xlu0 %v3105_v20, %s2851_s20 }
0x1696   :  { %v2054_v16 = vpop.permute.xlu0 %2053 }
0x1697   :  { %v2056_v17 = vmul.f32 %v2742_v8, %v2054_v16 }
0x1699   :  { %2062 = vrot.lane.b32.xlu1 %v2056_v17, %s2851_s20  ;;  %2058 = vrot.lane.b32.xlu0 %v2056_v17, %s2852_s1 }
0x169a   :  { %v920_v18 = vpop.permute.xlu0 %919 }
0x169b   :  { %922 = vst.msk [vmem:[#allocation9 + $0xa] sm:$0xc] %vm729_vm4, %v920_v18 }
0x169c   :  { %1872 = vst.msk [vmem:[#allocation9 + $0xc] sm:$0x3] %vm724_vm3, %v1870_v54 }
0x169e   :  { %v1301_v22 = vpop.permute.xlu0 %1300 }
0x169f   :  { %1303 = vst.msk [vmem:[#allocation9 + $0x6] sm:$0xc] %vm729_vm4, %v1301_v22 }
0x16a0   :  { %1488 = vst.msk [vmem:[#allocation9 + $0x8] sm:$0x3] %vm724_vm3, %v3084_v50 }
0x16a2   :  { %v1682_v21 = vpop.permute.xlu0 %1681 }
0x16a3   :  { %1684 = vst.msk [vmem:[#allocation9 + $0x2] sm:$0xc] %vm729_vm4, %v1682_v21 }
0x170b   :  { %v2063_v19 = vpop.permute.xlu1 %2062  ;;  %v2059_v20 = vpop.permute.xlu0 %2058 }
0x170c   :  { %2065 = vst.msk [vmem:[#allocation9 - $0x2] sm:$0xc] %vm729_vm4, %v2063_v19 }
0x170d   :  { %2061 = vst.msk [vmem:[#allocation9 + $0xe] sm:$0x3] %vm724_vm3, %v2059_v20 }
0x170e   :  { %2822 = shalt.err (!%p2819_p0)
}
0x170f   :  { %s2823_s25 = scalar_lea.hbm %s3195_s6, 256 }
0x1710   :  { %p2824_p1 = scmp.ne.s32.totalorder %s3195_s6, %s2823_s25  ;;  %p2827_p2 = scmp.lt.u32.totalorder %s2823_s25, %s3195_s6 }
0x1712   :  { %p2829_p3 = pnand %p2827_p2, %p2824_p1 }
0x1714   :  { %2832 = shalt.err (!%p2829_p3)
}
0x1715   :  { %2077 = dma.vmem_to_hbm [thread:$0]  %s2072_s21, 256, %s3195_s6, [#allocation5], %s2846_s0, %s2846_s0, %s2847_s10  }
0x1716   :  { %2837 = dma.done.wait [#allocation5], 256  }
0x1717   :  { %2838 = vsyncadd [#allocation5], 4294967040 }
0x1718   :  { %2081 = vsyncpa [#allocation4], 1 }
0x1719   :  { %2082 = vsyncpa [#allocation7], 1 }
0x171a   :  { %2083 = vsyncpa [#allocation5], 1 }

</bundles_post_ra>
